<compile_context>
chip_gen: v7x
topology: tpu7x:2x2x1
jax: 0.10.0
libtpu: 0.0.40
codegen_flags: <defaults>
</compile_context>

<pallas_src>
import functools

import jax
import jax.numpy as jnp
from jax.experimental import pallas as pl
from jax.experimental.pallas import tpu as pltpu


def _mixer_kernel(A, D, q_ref, obs_ref,
                  w1_ref, bw1_ref,       # hyper_w1: (D, H), (1, H)
                  wb1_ref, bb1_ref,      # hyper_b1: (D, H), (1, H)
                  w2_ref,                # fused (W2 + Wb2) as a (1, H) row
                  bias_ref,              # fused A*(bw2 + bb2), (1, 1) in SMEM
                  out_ref):              # (1, bt) lane-dense output row
    q = q_ref[...]        # (bt, A)
    obs = obs_ref[...]    # (bt, A*D); obs[:, a*D:(a+1)*D] == observation[:, a, :]

    # --- mixing vector: s = (sum_a q_a * obs_a) @ W1 + (sum_a q_a) * bw1 ---
    qobs = q[:, 0:1] * obs[:, 0:D]                                  # (bt, D) VPU
    for a in range(1, A):                                           # A is small, unrolled
        qobs = qobs + q[:, a:a + 1] * obs[:, a * D:(a + 1) * D]
    qsum = jnp.sum(q, axis=1, keepdims=True)                        # (bt, 1)
    s = (jnp.dot(qobs, w1_ref[...], preferred_element_type=jnp.float32)
         + qsum * bw1_ref[...])                                     # (bt, H)

    # --- hidden_sum = sum_a relu(s + obs_a @ Wb1 + bb1) ---
    hidden_sum = jnp.zeros_like(s)
    for a in range(A):
        b1_a = (jnp.dot(obs[:, a * D:(a + 1) * D], wb1_ref[...],
                        preferred_element_type=jnp.float32)
                + bb1_ref[...])                                     # (bt, H)
        hidden_sum = hidden_sum + jnp.maximum(s + b1_a, 0.0)

    # --- out = hidden_sum @ (W2 + Wb2) + A*(bw2 + bb2), written as (1, bt) ---
    # NT dot_general contracts H and puts the batch tile on the lane axis.
    out_row = jax.lax.dot_general(
        w2_ref[...], hidden_sum,
        dimension_numbers=(((1,), (1,)), ((), ())),
        preferred_element_type=jnp.float32)                         # (1, bt)
    out_ref[...] = out_row + bias_ref[0, 0]


def mixer_forward(q_values, observation, params, *, block_b=1024):
    """q_values: (B, A), observation: (B, A, D) -> (B, 1)."""
    B, A = q_values.shape
    D = observation.shape[-1]
    H = params["w1"].shape[1]

    # Fuse the two H->1 hypernetwork heads (exact: both act on the same hidden
    # and are summed): one (1, H) weight row + one scalar bias.
    w2_row = (params["w2"] + params["wb2"]).reshape(1, H)
    bias2 = ((params["bw2"] + params["bb2"]) * A).reshape(1, 1)

    # Agent-major flattening keeps each batch element lane-contiguous.
    obs_flat = observation.reshape(B, A * D).astype(jnp.float32)
    q_values = q_values.astype(jnp.float32)

    # Batch tile: multiple of 128 when several grid steps are needed (keeps the
    # (1, bt) output block lane-aligned); otherwise just pad B up to 8 sublanes.
    if B <= block_b:
        bt = max(8, ((B + 7) // 8) * 8)
    else:
        bt = max(128, ((block_b + 127) // 128) * 128)
    b_pad = pl.cdiv(B, bt) * bt
    if b_pad != B:
        q_values = jnp.pad(q_values, ((0, b_pad - B), (0, 0)))
        obs_flat = jnp.pad(obs_flat, ((0, b_pad - B), (0, 0)))

    kernel = functools.partial(_mixer_kernel, A, D)

    out_row = pl.pallas_call(
        kernel,
        out_shape=jax.ShapeDtypeStruct((1, b_pad), jnp.float32),
        grid_spec=pltpu.PrefetchScalarGridSpec(
            num_scalar_prefetch=0,
            grid=(b_pad // bt,),
            in_specs=[
                pl.BlockSpec((bt, A), lambda b: (b, 0)),            # q_values
                pl.BlockSpec((bt, A * D), lambda b: (b, 0)),        # observation (flat)
                pl.BlockSpec((D, H), lambda b: (0, 0)),             # hyper_w1 weight
                pl.BlockSpec((1, H), lambda b: (0, 0)),             # hyper_w1 bias
                pl.BlockSpec((D, H), lambda b: (0, 0)),             # hyper_b1 weight
                pl.BlockSpec((1, H), lambda b: (0, 0)),             # hyper_b1 bias
                pl.BlockSpec((1, H), lambda b: (0, 0)),             # fused W2+Wb2 row
                pl.BlockSpec(memory_space=pltpu.MemorySpace.SMEM),  # fused scalar bias
            ],
            out_specs=pl.BlockSpec((1, bt), lambda b: (0, b)),
        ),
        compiler_params=pltpu.CompilerParams(
            dimension_semantics=("parallel",)),
    )(q_values, obs_flat,
      params["w1"], params["bw1"],
      params["wb1"], params["bb1"],
      w2_row, bias2)

    return out_row[:, :B].reshape(B, 1)


def mixer_reference(q_values, observation, params):
    """Plain-JAX replica of the PyTorch forward, for verification."""
    B, A = q_values.shape
    w1 = observation @ params["w1"] + params["bw1"]        # (B, A, H)
    b1 = observation @ params["wb1"] + params["bb1"]       # (B, A, H)
    q = q_values.reshape(B, 1, A)                          # (B, 1, A)
    hidden = jax.nn.relu(jnp.matmul(q, w1) + b1)           # (B, A, H)
    w2 = hidden @ params["w2"] + params["bw2"]             # (B, A, 1)
    b2 = hidden @ params["wb2"] + params["bb2"]            # (B, A, 1)
    return jnp.sum(w2 + b2, axis=1)                        # (B, 1)


def init_params(key, observation_dim, hidden_dim):
    """Deterministic nn.Linear-style init (uniform +/- 1/sqrt(fan_in))."""
    ks = jax.random.split(key, 8)

    def lin(kw, kb, fan_in, fan_out):
        bound = 1.0 / jnp.sqrt(jnp.float32(fan_in))
        w = jax.random.uniform(kw, (fan_in, fan_out), jnp.float32, -bound, bound)
        b = jax.random.uniform(kb, (1, fan_out), jnp.float32, -bound, bound)
        return w, b

    w1, bw1 = lin(ks[0], ks[1], observation_dim, hidden_dim)   # hyper_w1
    wb1, bb1 = lin(ks[2], ks[3], observation_dim, hidden_dim)  # hyper_b1
    w2, bw2 = lin(ks[4], ks[5], hidden_dim, 1)                 # hyper_w2
    wb2, bb2 = lin(ks[6], ks[7], hidden_dim, 1)                # hyper_b2
    return {"w1": w1, "bw1": bw1, "wb1": wb1, "bb1": bb1,
            "w2": w2, "bw2": bw2, "wb2": wb2, "bb2": bb2}


if __name__ == "__main__":
    # batch, num_agents, observation_dim, hidden_dim  (block_b=128 -> 2 grid steps)
    B, A, D, H = 256, 4, 16, 32

    key = jax.random.PRNGKey(0)
    kq, kobs, kp = jax.random.split(key, 3)

    q_values = jax.random.normal(kq, (B, A), jnp.float32)
    observation = jax.random.normal(kobs, (B, A, D), jnp.float32)
    params = init_params(kp, D, H)

    out = jax.block_until_ready(
        mixer_forward(q_values, observation, params, block_b=128))
    ref = jax.block_until_ready(mixer_reference(q_values, observation, params))

    assert out.shape == (B, 1), out.shape
    assert jnp.allclose(out, ref, atol=1e-3, rtol=1e-4), (out, ref)

    print("KERNEL_OK")
</pallas_src>

<mosaic_0001>
module attributes {stable_mosaic.version = 11 : i64} {
  func.func @_mixer_kernel(%arg0: i32, %arg1: memref<128x4xf32, #tpu.memory_space<vmem>>, %arg2: memref<128x64xf32, #tpu.memory_space<vmem>>, %arg3: memref<16x32xf32, #tpu.memory_space<vmem>>, %arg4: memref<1x32xf32, #tpu.memory_space<vmem>>, %arg5: memref<16x32xf32, #tpu.memory_space<vmem>>, %arg6: memref<1x32xf32, #tpu.memory_space<vmem>>, %arg7: memref<1x32xf32, #tpu.memory_space<vmem>>, %arg8: memref<1x1xf32, #tpu.memory_space<smem>>, %arg9: memref<1x128xf32, #tpu.memory_space<vmem>>) attributes {dimension_semantics = [#tpu.dimension_semantics<parallel>], iteration_bounds = array<i64: 2>, scalar_prefetch = 0 : i64, scratch_operands = 0 : i64, tpu.core_type = #tpu.core_type<tc>, window_params = [{transform_indices = @transform_0, window_bounds = array<i64: 128, 4>}, {transform_indices = @transform_1, window_bounds = array<i64: 128, 64>}, {pipeline_mode = #tpu.pipeline_mode<synchronous>, transform_indices = @transform_2, window_bounds = array<i64: 16, 32>}, {pipeline_mode = #tpu.pipeline_mode<synchronous>, transform_indices = @transform_3, window_bounds = array<i64: 1, 32>}, {pipeline_mode = #tpu.pipeline_mode<synchronous>, transform_indices = @transform_4, window_bounds = array<i64: 16, 32>}, {pipeline_mode = #tpu.pipeline_mode<synchronous>, transform_indices = @transform_5, window_bounds = array<i64: 1, 32>}, {pipeline_mode = #tpu.pipeline_mode<synchronous>, transform_indices = @transform_6, window_bounds = array<i64: 1, 32>}, {transform_indices = @transform_7, window_bounds = array<i64: 1, 1>}, {transform_indices = @transform_8, window_bounds = array<i64: 1, 128>}]} {
    %c0 = arith.constant 0 : index
    %c0_0 = arith.constant 0 : index
    %0 = vector.load %arg1[%c0, %c0_0] : memref<128x4xf32, #tpu.memory_space<vmem>>, vector<128x4xf32>
    %c0_1 = arith.constant 0 : index
    %c0_2 = arith.constant 0 : index
    %1 = vector.load %arg2[%c0_1, %c0_2] : memref<128x64xf32, #tpu.memory_space<vmem>>, vector<128x64xf32>
    %2 = vector.extract_strided_slice %0 {offsets = [0, 0], sizes = [128, 1], strides = [1, 1]} : vector<128x4xf32> to vector<128x1xf32>
    %3 = vector.extract_strided_slice %1 {offsets = [0, 0], sizes = [128, 16], strides = [1, 1]} : vector<128x64xf32> to vector<128x16xf32>
    %4 = vector.broadcast %2 : vector<128x1xf32> to vector<128x16xf32>
    %5 = arith.mulf %4, %3 : vector<128x16xf32>
    %6 = vector.extract_strided_slice %0 {offsets = [0, 1], sizes = [128, 1], strides = [1, 1]} : vector<128x4xf32> to vector<128x1xf32>
    %7 = vector.extract_strided_slice %1 {offsets = [0, 16], sizes = [128, 16], strides = [1, 1]} : vector<128x64xf32> to vector<128x16xf32>
    %8 = vector.broadcast %6 : vector<128x1xf32> to vector<128x16xf32>
    %9 = arith.mulf %8, %7 : vector<128x16xf32>
    %10 = arith.addf %5, %9 : vector<128x16xf32>
    %11 = vector.extract_strided_slice %0 {offsets = [0, 2], sizes = [128, 1], strides = [1, 1]} : vector<128x4xf32> to vector<128x1xf32>
    %12 = vector.extract_strided_slice %1 {offsets = [0, 32], sizes = [128, 16], strides = [1, 1]} : vector<128x64xf32> to vector<128x16xf32>
    %13 = vector.broadcast %11 : vector<128x1xf32> to vector<128x16xf32>
    %14 = arith.mulf %13, %12 : vector<128x16xf32>
    %15 = arith.addf %10, %14 : vector<128x16xf32>
    %16 = vector.extract_strided_slice %0 {offsets = [0, 3], sizes = [128, 1], strides = [1, 1]} : vector<128x4xf32> to vector<128x1xf32>
    %17 = vector.extract_strided_slice %1 {offsets = [0, 48], sizes = [128, 16], strides = [1, 1]} : vector<128x64xf32> to vector<128x16xf32>
    %18 = vector.broadcast %16 : vector<128x1xf32> to vector<128x16xf32>
    %19 = arith.mulf %18, %17 : vector<128x16xf32>
    %20 = arith.addf %15, %19 : vector<128x16xf32>
    %cst = arith.constant dense<0.000000e+00> : vector<128xf32>
    %21 = vector.multi_reduction <add>, %0, %cst [1] : vector<128x4xf32> to vector<128xf32>
    %22 = vector.shape_cast %21 : vector<128xf32> to vector<128x1xf32>
    %c0_3 = arith.constant 0 : index
    %c0_4 = arith.constant 0 : index
    %23 = vector.load %arg3[%c0_3, %c0_4] : memref<16x32xf32, #tpu.memory_space<vmem>>, vector<16x32xf32>
    %cst_5 = arith.constant dense<0.000000e+00> : vector<128x32xf32>
    %24 = tpu.matmul %20, %23, %cst_5 {dimension_numbers = #tpu.dot_dimension_numbers<[1], [0], [0], [1], [0, 0, 1, 1], [], []>} : vector<128x16xf32>, vector<16x32xf32>, vector<128x32xf32> -> vector<128x32xf32>
    %c0_6 = arith.constant 0 : index
    %c0_7 = arith.constant 0 : index
    %25 = vector.load %arg4[%c0_6, %c0_7] : memref<1x32xf32, #tpu.memory_space<vmem>>, vector<1x32xf32>
    %26 = vector.broadcast %22 : vector<128x1xf32> to vector<128x32xf32>
    %27 = vector.broadcast %25 : vector<1x32xf32> to vector<128x32xf32>
    %28 = arith.mulf %26, %27 : vector<128x32xf32>
    %29 = arith.addf %24, %28 : vector<128x32xf32>
    %cst_8 = arith.constant 0.000000e+00 : f32
    %30 = vector.broadcast %cst_8 : f32 to vector<128x32xf32>
    %31 = vector.extract_strided_slice %1 {offsets = [0, 0], sizes = [128, 16], strides = [1, 1]} : vector<128x64xf32> to vector<128x16xf32>
    %c0_9 = arith.constant 0 : index
    %c0_10 = arith.constant 0 : index
    %32 = vector.load %arg5[%c0_9, %c0_10] : memref<16x32xf32, #tpu.memory_space<vmem>>, vector<16x32xf32>
    %cst_11 = arith.constant dense<0.000000e+00> : vector<128x32xf32>
    %33 = tpu.matmul %31, %32, %cst_11 {dimension_numbers = #tpu.dot_dimension_numbers<[1], [0], [0], [1], [0, 0, 1, 1], [], []>} : vector<128x16xf32>, vector<16x32xf32>, vector<128x32xf32> -> vector<128x32xf32>
    %c0_12 = arith.constant 0 : index
    %c0_13 = arith.constant 0 : index
    %34 = vector.load %arg6[%c0_12, %c0_13] : memref<1x32xf32, #tpu.memory_space<vmem>>, vector<1x32xf32>
    %35 = vector.broadcast %34 : vector<1x32xf32> to vector<128x32xf32>
    %36 = arith.addf %33, %35 : vector<128x32xf32>
    %37 = arith.addf %29, %36 : vector<128x32xf32>
    %cst_14 = arith.constant 0.000000e+00 : f32
    %38 = vector.broadcast %cst_14 : f32 to vector<128x32xf32>
    %39 = arith.maximumf %37, %38 : vector<128x32xf32>
    %40 = arith.addf %30, %39 : vector<128x32xf32>
    %41 = vector.extract_strided_slice %1 {offsets = [0, 16], sizes = [128, 16], strides = [1, 1]} : vector<128x64xf32> to vector<128x16xf32>
    %c0_15 = arith.constant 0 : index
    %c0_16 = arith.constant 0 : index
    %42 = vector.load %arg5[%c0_15, %c0_16] : memref<16x32xf32, #tpu.memory_space<vmem>>, vector<16x32xf32>
    %cst_17 = arith.constant dense<0.000000e+00> : vector<128x32xf32>
    %43 = tpu.matmul %41, %42, %cst_17 {dimension_numbers = #tpu.dot_dimension_numbers<[1], [0], [0], [1], [0, 0, 1, 1], [], []>} : vector<128x16xf32>, vector<16x32xf32>, vector<128x32xf32> -> vector<128x32xf32>
    %c0_18 = arith.constant 0 : index
    %c0_19 = arith.constant 0 : index
    %44 = vector.load %arg6[%c0_18, %c0_19] : memref<1x32xf32, #tpu.memory_space<vmem>>, vector<1x32xf32>
    %45 = vector.broadcast %44 : vector<1x32xf32> to vector<128x32xf32>
    %46 = arith.addf %43, %45 : vector<128x32xf32>
    %47 = arith.addf %29, %46 : vector<128x32xf32>
    %cst_20 = arith.constant 0.000000e+00 : f32
    %48 = vector.broadcast %cst_20 : f32 to vector<128x32xf32>
    %49 = arith.maximumf %47, %48 : vector<128x32xf32>
    %50 = arith.addf %40, %49 : vector<128x32xf32>
    %51 = vector.extract_strided_slice %1 {offsets = [0, 32], sizes = [128, 16], strides = [1, 1]} : vector<128x64xf32> to vector<128x16xf32>
    %c0_21 = arith.constant 0 : index
    %c0_22 = arith.constant 0 : index
    %52 = vector.load %arg5[%c0_21, %c0_22] : memref<16x32xf32, #tpu.memory_space<vmem>>, vector<16x32xf32>
    %cst_23 = arith.constant dense<0.000000e+00> : vector<128x32xf32>
    %53 = tpu.matmul %51, %52, %cst_23 {dimension_numbers = #tpu.dot_dimension_numbers<[1], [0], [0], [1], [0, 0, 1, 1], [], []>} : vector<128x16xf32>, vector<16x32xf32>, vector<128x32xf32> -> vector<128x32xf32>
    %c0_24 = arith.constant 0 : index
    %c0_25 = arith.constant 0 : index
    %54 = vector.load %arg6[%c0_24, %c0_25] : memref<1x32xf32, #tpu.memory_space<vmem>>, vector<1x32xf32>
    %55 = vector.broadcast %54 : vector<1x32xf32> to vector<128x32xf32>
    %56 = arith.addf %53, %55 : vector<128x32xf32>
    %57 = arith.addf %29, %56 : vector<128x32xf32>
    %cst_26 = arith.constant 0.000000e+00 : f32
    %58 = vector.broadcast %cst_26 : f32 to vector<128x32xf32>
    %59 = arith.maximumf %57, %58 : vector<128x32xf32>
    %60 = arith.addf %50, %59 : vector<128x32xf32>
    %61 = vector.extract_strided_slice %1 {offsets = [0, 48], sizes = [128, 16], strides = [1, 1]} : vector<128x64xf32> to vector<128x16xf32>
    %c0_27 = arith.constant 0 : index
    %c0_28 = arith.constant 0 : index
    %62 = vector.load %arg5[%c0_27, %c0_28] : memref<16x32xf32, #tpu.memory_space<vmem>>, vector<16x32xf32>
    %cst_29 = arith.constant dense<0.000000e+00> : vector<128x32xf32>
    %63 = tpu.matmul %61, %62, %cst_29 {dimension_numbers = #tpu.dot_dimension_numbers<[1], [0], [0], [1], [0, 0, 1, 1], [], []>} : vector<128x16xf32>, vector<16x32xf32>, vector<128x32xf32> -> vector<128x32xf32>
    %c0_30 = arith.constant 0 : index
    %c0_31 = arith.constant 0 : index
    %64 = vector.load %arg6[%c0_30, %c0_31] : memref<1x32xf32, #tpu.memory_space<vmem>>, vector<1x32xf32>
    %65 = vector.broadcast %64 : vector<1x32xf32> to vector<128x32xf32>
    %66 = arith.addf %63, %65 : vector<128x32xf32>
    %67 = arith.addf %29, %66 : vector<128x32xf32>
    %cst_32 = arith.constant 0.000000e+00 : f32
    %68 = vector.broadcast %cst_32 : f32 to vector<128x32xf32>
    %69 = arith.maximumf %67, %68 : vector<128x32xf32>
    %70 = arith.addf %60, %69 : vector<128x32xf32>
    %c0_33 = arith.constant 0 : index
    %c0_34 = arith.constant 0 : index
    %71 = vector.load %arg7[%c0_33, %c0_34] : memref<1x32xf32, #tpu.memory_space<vmem>>, vector<1x32xf32>
    %cst_35 = arith.constant dense<0.000000e+00> : vector<1x128xf32>
    %72 = tpu.matmul %71, %70, %cst_35 {dimension_numbers = #tpu.dot_dimension_numbers<[1], [1], [0], [0], [0, 0, 1, 0], [], []>} : vector<1x32xf32>, vector<128x32xf32>, vector<1x128xf32> -> vector<1x128xf32>
    %c0_36 = arith.constant 0 : index
    %c0_37 = arith.constant 0 : index
    %73 = memref.load %arg8[%c0_36, %c0_37] : memref<1x1xf32, #tpu.memory_space<smem>>
    %74 = vector.broadcast %73 : f32 to vector<1x128xf32>
    %75 = arith.addf %72, %74 : vector<1x128xf32>
    %c0_38 = arith.constant 0 : index
    %c0_39 = arith.constant 0 : index
    %76 = vector.load %arg9[%c0_38, %c0_39] : memref<1x128xf32, #tpu.memory_space<vmem>>, vector<1x128xf32>
    tpu.vector_store %arg9[%c0_38, %c0_39], %75 {strides = array<i32>} : memref<1x128xf32, #tpu.memory_space<vmem>>, vector<1x128xf32>,
    return
  }
  func.func @transform_0(%arg0: i32) -> (i32, i32) {
    %c0_i32 = arith.constant 0 : i32
    %c0_i32_0 = arith.constant 0 : i32
    return %arg0, %c0_i32 : i32, i32
  }
  func.func @transform_1(%arg0: i32) -> (i32, i32) {
    %c0_i32 = arith.constant 0 : i32
    %c0_i32_0 = arith.constant 0 : i32
    return %arg0, %c0_i32 : i32, i32
  }
  func.func @transform_2(%arg0: i32) -> (i32, i32) {
    %c0_i32 = arith.constant 0 : i32
    %c0_i32_0 = arith.constant 0 : i32
    %c0_i32_1 = arith.constant 0 : i32
    return %c0_i32, %c0_i32_0 : i32, i32
  }
  func.func @transform_3(%arg0: i32) -> (i32, i32) {
    %c0_i32 = arith.constant 0 : i32
    %c0_i32_0 = arith.constant 0 : i32
    %c0_i32_1 = arith.constant 0 : i32
    return %c0_i32, %c0_i32_0 : i32, i32
  }
  func.func @transform_4(%arg0: i32) -> (i32, i32) {
    %c0_i32 = arith.constant 0 : i32
    %c0_i32_0 = arith.constant 0 : i32
    %c0_i32_1 = arith.constant 0 : i32
    return %c0_i32, %c0_i32_0 : i32, i32
  }
  func.func @transform_5(%arg0: i32) -> (i32, i32) {
    %c0_i32 = arith.constant 0 : i32
    %c0_i32_0 = arith.constant 0 : i32
    %c0_i32_1 = arith.constant 0 : i32
    return %c0_i32, %c0_i32_0 : i32, i32
  }
  func.func @transform_6(%arg0: i32) -> (i32, i32) {
    %c0_i32 = arith.constant 0 : i32
    %c0_i32_0 = arith.constant 0 : i32
    %c0_i32_1 = arith.constant 0 : i32
    return %c0_i32, %c0_i32_0 : i32, i32
  }
  func.func @transform_7(%arg0: i32) -> (i32, i32) {
    %c0_i32 = arith.constant 0 : i32
    %c0_i32_0 = arith.constant 0 : i32
    %c0_i32_1 = arith.constant 0 : i32
    return %c0_i32, %c0_i32_0 : i32, i32
  }
  func.func @transform_8(%arg0: i32) -> (i32, i32) {
    %c0_i32 = arith.constant 0 : i32
    %c0_i32_0 = arith.constant 0 : i32
    return %c0_i32, %arg0 : i32, i32
  }
}

</mosaic_0001>

<bundles_post_ra>
// kernel: tpu_custom_call.1
= control target key start
LH: loop header
LB: loop body
LE: loop exit
PB: predicated region body
PF: predicated region fallthrough
CT: control target
= control target key end

     0   :  { %s4145_s0 = inlined_call_operand.vmem [shape: f32[256,4], index: 0, kind: input, shape index: {}]   ;;  %s4146_s1 = inlined_call_operand.vmem [shape: f32[256,64], index: 1, kind: input, shape index: {}]   ;;  %s4147_s2 = inlined_call_operand.vmem [shape: f32[16,32], index: 2, kind: input, shape index: {}]   ;;  %s4148_s3 = inlined_call_operand.vmem [shape: f32[1,32], index: 3, kind: input, shape index: {}]   ;;  %s4149_s4 = inlined_call_operand.vmem [shape: f32[16,32], index: 4, kind: input, shape index: {}]   ;;  %s4150_s5 = inlined_call_operand.vmem [shape: f32[1,32], index: 5, kind: input, shape index: {}]   ;;  %s4151_s6 = inlined_call_operand.vmem [shape: f32[1,32], index: 6, kind: input, shape index: {}]   ;;  %s4152_s7 = inlined_call_operand.<no memory space> [shape: f32[1,1], index: 7, kind: input, shape index: {}]   ;;  %s4153_s8 = inlined_call_operand.hbm [shape: f32[1,256], index: 8, kind: output, shape index: {}]  }
   0x1   :  { %13 = sst [smem:[#allocation2]] %s4152_s7 }
   0x2   :  { %14 = vsyncpa [#allocation4], 0 }
   0x3   :  { %16 = vsyncpa [#allocation4 + $0x1], 0  ;;  %s3076_s29 = smov 0   ;;  %s3078_s30 = smov 0  }
   0x4   :  { %s3080_s9 = smov 0   ;;  %s3082_s10 = smov 0  }
   0x5 LB: > { %s2430_s7 = sadd.s32 4294967295, %s3015_s10   ;;  %s2431_s11 = sadd.s32 4294967294, %s3015_s10   ;;  %s3015_s10 = sphi %s3082_s10, %s4161_s10   ;;  %s3011_s9 = sphi %s3080_s9, %s4160_s9   ;;  %s3007_s30 = sphi %s3078_s30, %s4159_s30   ;;  %s3003_s29 = sphi %s3076_s29, %s4158_s29  }
   0x6   : > { %s3099_s12 = sadd.s32 1, %s3015_s10   ;;  %s207_s13 = sadd.s32 1, %s3011_s9 }
   0x7   : > { %s204_s14 = ssub.s32 %s3015_s10, %s3099_s12  ;;  %p217_p0 = scmp.ne.s32.totalorder %s3011_s9, %s3007_s30 }
   0x8   : > { %p205_p1 = scmp.eq.s32.totalorder %s204_s14, 0  ;;  %p218_p2 = scmp.eq.s32.totalorder %s2430_s7, 1 }
   0x9   : > { %p223_p3 = scmp.ne.s32.totalorder %s3007_s30, %s3003_s29  ;;  %p224_p4 = scmp.eq.s32.totalorder %s2431_s11, 1 }
   0xa   : > { %s3109_s15 = scalar_select %p205_p1, %s3011_s9, %s207_s13  }
   0xb   : > { %p3111_p5 = por %p218_p2, %p217_p0  ;;  %p3115_p6 = por %p224_p4, %p223_p3 }
   0xc   : > { %p2434_p7 = scmp.ge.s32.totalorder %s3015_s10, 1  ;;  %p278_p8 = scmp.lt.s32.totalorder %s3015_s10, 3 }
   0xe   : > { %p279_p9 = pnand %p2434_p7, %p278_p8 }
   0xf   : > { %s3121_s18 = sshll.u32 (!%p279_p9), %s2430_s7, 4  ;;  %v3017_v0 = vmov (!%p279_p9), 2   ;;  %v3018_v1 = vmov (!%p279_p9), 1   ;;  %v3019_v5 = vmov (!%p279_p9), 3   ;;  %v3020_v17 = vmov (!%p279_p9), 0   ;;  %s3021_s27 = smov (!%p279_p9), 112  }
  0x10   : > { %282 = sbr.rel (%p279_p9) target bundleno = 981 (0x3d5), region = 52  ;;  %2925 = vset.pattern.permute.xlu1 (!%p279_p9), %v3017_v0  ;;  %2924 = vset.pattern.permute.xlu0 (!%p279_p9), %v3018_v1  ;;  %p317_p10 = scmp.lt.s32.totalorder (!%p279_p9), %s3121_s18, 31  ;;  %v985_v44 = vld [vmem:[%s4147_s2] sm:$0xff] (!%p279_p9)  ;;  %v986_v45 = vld [vmem:[%s4147_s2 + $0x8] sm:$0xff] (!%p279_p9)  ;;  %vm1010_vm0 = vcmask (!%p279_p9), 130048   ;;  %vm936_vm1 = vcmask (!%p279_p9), 31744  }
  0x11   : > { %s3022_s28 = smov (!%p279_p9), 80   ;;  %s3023_s7 = smov (!%p279_p9), 96   ;;  %v2823_v49 = vpack.c.bf16 (!%p279_p9), %v986_v45, %v985_v44  ;;  %vm3025_vm2 = vmmov (!%p279_p9), 0   ;;  %vm2228_vm3 = vcmask (!%p279_p9), 261120  }
  0x12   : > { %vm4002_vm4 = vmpackc.low (!%p279_p9), %vm2228_vm3, %vm2228_vm3  ;;  %s2226_s11 = sld [smem:[#allocation2]] (!%p279_p9)  ;;  %s314_s13 = sand.u32 (!%p279_p9), 1, %s3007_s30  }
  0x13   : > { %2824 = vmatprep.subr.bf16.mxu0 (!%p279_p9), %v2823_v49  ;;  %s315_s14 = scalar_lea.vmem (!%p279_p9), [#allocation3], %s314_s13  ;;  %s4103_s22 = scalar_lea.hbm (!%p279_p9), %s4153_s8, %s3121_s18 }
  0x14   : > { %2826 = vmatpush3.bf16.msra.mxu0 (!%p279_p9), %v2823_v49  ;;  %s2352_s24 = scalar_lea.sflag (!%p279_p9), [#allocation4], %s314_s13  ;;  %s3027_s25 = smov (!%p279_p9), [#allocation3]  }
  0x17   : > { %s3127_s19 = scalar_select %p317_p10, %s3121_s18, 31 }
  0x19   : > { %s2436_s20 = sshll.u32 %s3127_s19, 3  ;;  %s2364_s19 = sshll.u32 %s315_s14, 4  ;;  %s4105_s19 = int_to_ptr.vmem [resolvable:$true] %s2364_s19 }
  0x1a   : > { %s3135_s23 = scalar_lea.vmem %s4145_s0, %s2436_s20  ;;  %s3259_s26 = scalar_lea.vmem %s4146_s1, %s2436_s20 }
  0x1b   : > { %v3138_v2 = vld [vmem:[%s3135_s23] sm:$0xff]  ;;  %v3143_v3 = vld [vmem:[%s3135_s23 + $0x8] sm:$0xff]  ;;  %v3148_v4 = vld [vmem:[%s3135_s23 + $0x10] sm:$0xff] }
  0x1c   : > { %617 = vperm.xlu1 %2925, %v3138_v2   ;;  %457 = vperm.xlu0 %2924, %v3138_v2   ;;  %v3154_v6 = vld [vmem:[%s3135_s23 + $0x18] sm:$0xff]  ;;  %v3163_v7 = vld [vmem:[%s3135_s23 + $0x20] sm:$0xff]  ;;  %v3168_v8 = vld [vmem:[%s3135_s23 + $0x30] sm:$0xff] }
  0x1d   : > { %v3172_v9 = vld [vmem:[%s3135_s23 + $0x28] sm:$0xff]  ;;  %v3176_v10 = vld [vmem:[%s3135_s23 + $0x40] sm:$0xff]  ;;  %v3181_v11 = vld [vmem:[%s3135_s23 + $0x50] sm:$0xff] }
  0x1e   : > { %v3187_v12 = vld [vmem:[%s3135_s23 + $0x60] sm:$0xff]  ;;  %v3193_v13 = vld [vmem:[%s3135_s23 + $0x70] sm:$0xff]  ;;  %v3199_v14 = vld [vmem:[%s3135_s23 + $0x38] sm:$0xff] }
  0x1f   : > { %v3215_v15 = vld [vmem:[%s3135_s23 + $0x48] sm:$0xff]  ;;  %v3220_v16 = vld [vmem:[%s3135_s23 + $0x78] sm:$0xff]  ;;  %v3274_v30 = vld [vmem:[%s3259_s26] sm:$0xff] }
  0x20   : > { %621 = vperm.xlu1 %2925, %v3143_v3   ;;  %461 = vperm.xlu0 %2924, %v3143_v3   ;;  %v3232_v18 = vld [vmem:[%s3135_s23 + $0x58] sm:$0xff]  ;;  %v3242_v19 = vld [vmem:[%s3135_s23 + $0x68] sm:$0xff]  ;;  %v3305_v50 = vld [vmem:[%s3259_s26 + $0x10] sm:$0xff] }
  0x21   : > { %v3262_v22 = vld [vmem:[%s3259_s26 + $0x8] sm:$0xff]  ;;  %2680 = vmatprep.mubr.msk.f32.mxu1 %vm1010_vm0, %v3274_v30  ;;  %v3314_v53 = vld [vmem:[%s3259_s26 + $0x18] sm:$0xff]  ;;  %v3327_v63 = vld [vmem:[%s3259_s26 + $0x20] sm:$0xff] }
  0x24   : > { %2926 = vset.pattern.permute.xlu1 %v3019_v5  ;;  %465 = vperm.xlu0 %2924, %v3148_v4  }
  0x25   : > { %777 = vperm.xlu1 %2926, %v3138_v2  }
  0x28   : > { %469 = vperm.xlu0 %2924, %v3154_v6  }
  0x29   : > { %781 = vperm.xlu1 %2926, %v3143_v3  }
  0x2c   : > { %2927 = vset.pattern.permute.xlu0 %v3017_v0 }
  0x2d   : > { %2928 = vset.pattern.permute.xlu1 %v3017_v0  ;;  %625 = vperm.xlu0 %2927, %v3148_v4  }
  0x2e   : > { %629 = vperm.xlu1 %2928, %v3154_v6  }
  0x31   : > { %633 = vperm.xlu0 %2927, %v3163_v7  }
  0x32   : > { %2929 = vset.pattern.permute.xlu1 %v3018_v1 }
  0x33   : > { %473 = vperm.xlu1 %2929, %v3163_v7  }
  0x35   : > { %641 = vperm.xlu0 %2927, %v3168_v8  }
  0x37   : > { %477 = vperm.xlu1 %2929, %v3172_v9  }
  0x39   : > { %649 = vperm.xlu0 %2927, %v3176_v10  }
  0x3b   : > { %2930 = vset.pattern.permute.xlu1 %v3019_v5 }
  0x3c   : > { %789 = vperm.xlu1 %2930, %v3154_v6  }
  0x3d   : > { %657 = vperm.xlu0 %2927, %v3181_v11  }
  0x40   : > { %2931 = vset.pattern.permute.xlu1 %v3017_v0 }
  0x41   : > { %637 = vperm.xlu1 %2931, %v3172_v9   ;;  %665 = vperm.xlu0 %2927, %v3187_v12  }
  0x45   : > { %2932 = vset.pattern.permute.xlu1 %v3018_v1  ;;  %673 = vperm.xlu0 %2927, %v3193_v13  }
  0x46   : > { %481 = vperm.xlu1 %2932, %v3168_v8  }
  0x49   : > { %2946 = vset.pattern.permute.xlu0 %v3019_v5 }
  0x4a   : > { %485 = vperm.xlu1 %2932, %v3199_v14   ;;  %785 = vperm.xlu0 %2946, %v3148_v4  }
  0x4e   : > { %2933 = vset.pattern.permute.xlu1 %v3019_v5  ;;  %793 = vperm.xlu0 %2946, %v3163_v7  }
  0x4f   : > { %797 = vperm.xlu1 %2933, %v3172_v9  }
  0x52   : > { %801 = vperm.xlu0 %2946, %v3168_v8  }
  0x53   : > { %2934 = vset.pattern.permute.xlu1 %v3017_v0 }
  0x54   : > { %645 = vperm.xlu1 %2934, %v3199_v14  }
  0x56   : > { %809 = vperm.xlu0 %2946, %v3176_v10  }
  0x58   : > { %2935 = vset.pattern.permute.xlu1 %v3018_v1 }
  0x59   : > { %489 = vperm.xlu1 %2935, %v3176_v10  }
  0x5a   : > { %817 = vperm.xlu0 %2946, %v3181_v11  }
  0x5d   : > { %493 = vperm.xlu1 %2935, %v3215_v15  }
  0x5e   : > { %825 = vperm.xlu0 %2946, %v3187_v12  }
  0x61   : > { %2936 = vset.pattern.permute.xlu1 %v3019_v5 }
  0x62   : > { %805 = vperm.xlu1 %2936, %v3199_v14   ;;  %837 = vperm.xlu0 %2946, %v3220_v16  }
  0x66   : > { %2937 = vset.pattern.permute.xlu1 %v3017_v0  ;;  %2950 = vset.pattern.permute.xlu0 %v3020_v17 }
  0x67   : > { %653 = vperm.xlu1 %2937, %v3215_v15   ;;  %372 = vperm.xlu0 %2950, %v3148_v4  }
  0x6b   : > { %2938 = vset.pattern.permute.xlu1 %v3018_v1  ;;  %387 = vperm.xlu0 %2950, %v3172_v9  }
  0x6c   : > { %497 = vperm.xlu1 %2938, %v3181_v11  }
  0x70   : > { %501 = vperm.xlu1 %2938, %v3232_v18  }
  0x74   : > { %2939 = vset.pattern.permute.xlu1 %v3019_v5 }
  0x75   : > { %813 = vperm.xlu1 %2939, %v3215_v15  }
  0x79   : > { %2940 = vset.pattern.permute.xlu1 %v3017_v0 }
  0x7a   : > { %661 = vperm.xlu1 %2940, %v3232_v18  }
  0x7e   : > { %2941 = vset.pattern.permute.xlu1 %v3018_v1 }
  0x7f   : > { %505 = vperm.xlu1 %2941, %v3187_v12  }
  0x83   : > { %509 = vperm.xlu1 %2941, %v3242_v19  }
  0x87   : > { %2942 = vset.pattern.permute.xlu1 %v3019_v5 }
  0x88   : > { %821 = vperm.xlu1 %2942, %v3232_v18  }
  0x8c   : > { %2943 = vset.pattern.permute.xlu1 %v3017_v0 }
  0x8d   : > { %669 = vperm.xlu1 %2943, %v3242_v19  }
  0x91   : > { %2944 = vset.pattern.permute.xlu1 %v3018_v1 }
  0x92   : > { %513 = vperm.xlu1 %2944, %v3193_v13  }
  0x96   : > { %517 = vperm.xlu1 %2944, %v3220_v16  }
  0x9a   : > { %2945 = vset.pattern.permute.xlu1 %v3019_v5 }
  0x9b   : > { %829 = vperm.xlu1 %2945, %v3242_v19   ;;  %v618_v20 = vpop.permute.xlu1 %617  ;;  %v458_v21 = vpop.permute.xlu0 %457 }
  0x9c   : > { %v520_v39 = vmul.f32 %v458_v21, %v3274_v30  ;;  %v680_v42 = vmul.f32 %v618_v20, %v3274_v30 }
  0x9f   : > { %2947 = vset.pattern.permute.xlu1 %v3017_v0  ;;  %v622_v23 = vpop.permute.xlu1 %621  ;;  %v462_v24 = vpop.permute.xlu0 %461 }
  0xa0   : > { %v521_v25 = vmul.f32 %v462_v24, %v3262_v22  ;;  %677 = vperm.xlu1 %2947, %v3220_v16   ;;  %v681_v46 = vmul.f32 %v622_v23, %v3262_v22 }
  0xa2   : > { %554 = vrot.lane.b32.xlu0 %v521_v25, %s3021_s27  ;;  %v1204_v25 = vld [vmem:[%s4149_s4] sm:$0xff] }
  0xa3   : > { %v466_v26 = vpop.permute.xlu0 %465 }
  0xa4   : > { %2948 = vset.pattern.permute.xlu1 %v3019_v5  ;;  %v778_v27 = vpop.permute.xlu1 %777  ;;  %v522_v51 = vmul.f32 %v466_v26, %v3305_v50  ;;  %v1205_v26 = vld [vmem:[%s4149_s4 + $0x8] sm:$0xff] }
  0xa5   : > { %833 = vperm.xlu1 %2948, %v3193_v13   ;;  %v840_v31 = vmul.f32 %v778_v27, %v3274_v30  ;;  %v3346_v27 = vpack.c.bf16 %v1205_v26, %v1204_v25 }
  0xa6   : > { %392 = vperm.xlu0 %2950, %v3168_v8  }
  0xa7   : > { %v470_v28 = vpop.permute.xlu0 %469  ;;  %2828 = vmatprep.subr.bf16.mxu1 %v3346_v27  ;;  %2832 = vmatprep.subr.bf16.mxu0 %v3346_v27 }
  0xa8   : > { %v782_v29 = vpop.permute.xlu1 %781  ;;  %v523_v55 = vmul.f32 %v470_v28, %v3314_v53  ;;  %2830 = vmatpush3.bf16.msra.mxu1 %v3346_v27 }
  0xa9   : > { %2949 = vset.pattern.permute.xlu1 %v3020_v17  ;;  %v841_v34 = vmul.f32 %v782_v29, %v3262_v22  ;;  %v3333_v17 = vld [vmem:[%s3259_s26 + $0x28] sm:$0xff]  ;;  %2836 = vmatprep.subr.bf16.mxu1 %v3346_v27 }
  0xaa   : > { %362 = vperm.xlu1 %2949, %v3138_v2   ;;  %397 = vperm.xlu0 %2950, %v3199_v14  }
  0xab   : > { %2681 = vmatmul.mubr.msk.f32.vlgmr.msra.gmra.mrb[0].mxu1 %vm1010_vm0, %v3262_v22 }
  0xac   : > { %v626_v32 = vpop.permute.xlu0 %625  ;;  %2683 = vmatprep.mubr.msk.f32.mxu1 %vm1010_vm0, %v3305_v50  ;;  %2838 = vmatpush3.bf16.msra.mxu1 %v3346_v27 }
  0xad   : > { %v630_v33 = vpop.permute.xlu1 %629  ;;  %v682_v59 = vmul.f32 %v626_v32, %v3305_v50 }
  0xae   : > { %367 = vperm.xlu1 %2949, %v3143_v3   ;;  %872 = vrot.lane.b32.xlu0 %v840_v31, %s3022_s28  ;;  %v683_v62 = vmul.f32 %v630_v33, %v3314_v53 }
  0xaf   : > { %2684 = vmatmul.mubr.msk.f32.gmra.mrb[2].mxu1 %vm1010_vm0, %v3314_v53 }
  0xb0   : > { %v634_v35 = vpop.permute.xlu0 %633  ;;  %2686 = vmatprep.mubr.msk.f32.mxu1 %vm1010_vm0, %v3327_v63 }
  0xb1   : > { %v684_v28 = vmul.f32 %v634_v35, %v3327_v63 }
  0xb2   : > { %377 = vperm.xlu1 %2949, %v3154_v6   ;;  %v474_v36 = vpop.permute.xlu1 %473  ;;  %874 = vrot.lane.b32.xlu0 %v841_v34, %s3022_s28  ;;  %v3364_v34 = vld [vmem:[%s3259_s26 + $0x30] sm:$0xff] }
  0xb3   : > { %v524_v1 = vmul.f32 %v474_v36, %v3327_v63  ;;  %v3370_v36 = vld [vmem:[%s3259_s26 + $0x38] sm:$0xff]  ;;  %2687 = vmatmul.mubr.msk.f32.gmra.mrb[4].mxu1 %vm1010_vm0, %v3333_v17 }
  0xb4   : > { %v3282_v37 = vpop.permute.xlu0 %641  ;;  %2689 = vmatprep.mubr.msk.f32.mxu1 %vm1010_vm0, %v3364_v34 }
  0xb5   : > { %v686_v45 = vmul.f32 %v3282_v37, %v3364_v34  ;;  %v3399_v37 = vld [vmem:[%s3259_s26 + $0x48] sm:$0xff] }
  0xb6   : > { %382 = vperm.xlu1 %2949, %v3163_v7   ;;  %v478_v38 = vpop.permute.xlu1 %477  ;;  %402 = vperm.xlu0 %2950, %v3176_v10  }
  0xb7   : > { %v525_v20 = vmul.f32 %v478_v38, %v3333_v17  ;;  %2690 = vmatmul.mubr.msk.f32.gmra.mrb[6].mxu1 %vm1010_vm0, %v3370_v36 }
  0xb8   : > { %v3287_v40 = vpop.permute.xlu0 %649 }
  0xba   : > { %552 = vrot.lane.b32.xlu1 %v520_v39, %s3021_s27  ;;  %407 = vperm.xlu0 %2950, %v3215_v15  }
  0xbb   : > { %v790_v41 = vpop.permute.xlu1 %789 }
  0xbc   : > { %v3292_v43 = vpop.permute.xlu0 %657  ;;  %v843_v60 = vmul.f32 %v790_v41, %v3314_v53 }
  0xbe   : > { %712 = vrot.lane.b32.xlu1 %v680_v42, %s3023_s7 }
  0xc0   : > { %v638_v47 = vpop.permute.xlu1 %637  ;;  %v3302_v48 = vpop.permute.xlu0 %665 }
  0xc1   : > { %v685_v32 = vmul.f32 %v638_v47, %v3333_v17 }
  0xc2   : > { %714 = vrot.lane.b32.xlu1 %v681_v46, %s3023_s7  ;;  %v3389_v46 = vld [vmem:[%s3259_s26 + $0x40] sm:$0xff] }
  0xc3   : > { %2692 = vmatprep.mubr.msk.f32.mxu1 %vm1010_vm0, %v3389_v46 }
  0xc4   : > { %v3311_v52 = vpop.permute.xlu0 %673  ;;  %2693 = vmatmul.mubr.msk.f32.gmra.mrb[8].mxu1 %vm1010_vm0, %v3399_v37 }
  0xc5   : > { %v482_v54 = vpop.permute.xlu1 %481 }
  0xc6   : > { %556 = vrot.lane.b32.xlu1 %v522_v51, %s3021_s27  ;;  %v526_v35 = vmul.f32 %v482_v54, %v3364_v34  ;;  %v3403_v54 = vld [vmem:[%s3259_s26 + $0x50] sm:$0xff] }
  0xc7   : > { %2695 = vmatprep.mubr.msk.f32.mxu1 %vm1010_vm0, %v3403_v54 }
  0xc9   : > { %v486_v56 = vpop.permute.xlu1 %485  ;;  %v786_v57 = vpop.permute.xlu0 %785 }
  0xca   : > { %v842_v58 = vmul.f32 %v786_v57, %v3305_v50  ;;  %558 = vrot.lane.b32.xlu1 %v523_v55, %s3021_s27  ;;  %v527_v39 = vmul.f32 %v486_v56, %v3370_v36  ;;  %v3412_v56 = vld [vmem:[%s3259_s26 + $0x58] sm:$0xff] }
  0xcb   : > { %2696 = vmatmul.mubr.msk.f32.gmra.mrb[10].mxu1 %vm1010_vm0, %v3412_v56 }
  0xcc   : > { %876 = vrot.lane.b32.xlu0 %v842_v58, %s3022_s28  ;;  %v3416_v58 = vld [vmem:[%s3259_s26 + $0x60] sm:$0xff] }
  0xcd   : > { %v794_v23 = vpop.permute.xlu0 %793  ;;  %2698 = vmatprep.mubr.msk.f32.mxu1 %vm1010_vm0, %v3416_v58 }
  0xce   : > { %v798_v61 = vpop.permute.xlu1 %797  ;;  %716 = vrot.lane.b32.xlu1 %v682_v59, %s3023_s7  ;;  %v844_v24 = vmul.f32 %v794_v23, %v3327_v63 }
  0xcf   : > { %v845_v31 = vmul.f32 %v798_v61, %v3333_v17  ;;  %v3426_v61 = vld [vmem:[%s3259_s26 + $0x68] sm:$0xff] }
  0xd0   : > { %878 = vrot.lane.b32.xlu0 %v843_v60, %s3022_s28  ;;  %2699 = vmatmul.mubr.msk.f32.gmra.mrb[12].mxu1 %vm1010_vm0, %v3426_v61 }
  0xd1   : > { %v802_v41 = vpop.permute.xlu0 %801 }
  0xd2   : > { %718 = vrot.lane.b32.xlu1 %v683_v62, %s3023_s7  ;;  %v846_v42 = vmul.f32 %v802_v41, %v3364_v34  ;;  %v3429_v62 = vld [vmem:[%s3259_s26 + $0x70] sm:$0xff] }
  0xd3   : > { %v646_v0 = vpop.permute.xlu1 %645  ;;  %2701 = vmatprep.mubr.msk.f32.mxu1 %vm1010_vm0, %v3429_v62 }
  0xd4   : > { %412 = vperm.xlu0 %2950, %v3181_v11   ;;  %v687_v51 = vmul.f32 %v646_v0, %v3370_v36 }
  0xd5   : > { %v810_v59 = vpop.permute.xlu0 %809 }
  0xd6   : > { %560 = vrot.lane.b32.xlu1 %v524_v1, %s3021_s27  ;;  %v848_v0 = vmul.f32 %v810_v59, %v3389_v46  ;;  %v688_v1 = vmul.f32 %v3287_v40, %v3389_v46 }
  0xd8   : > { %v490_v21 = vpop.permute.xlu1 %489  ;;  %417 = vperm.xlu0 %2950, %v3232_v18  }
  0xd9   : > { %v528_v55 = vmul.f32 %v490_v21, %v3389_v46  ;;  %v818_v26 = vpop.permute.xlu0 %817 }
  0xda   : > { %562 = vrot.lane.b32.xlu1 %v525_v20, %s3021_s27  ;;  %v3440_v20 = vld [vmem:[%s3259_s26 + $0x78] sm:$0xff]  ;;  %s2957_s26 = sshll.u32 %s3027_s25, 4  ;;  %s2958_s26 = int_to_ptr.vmem [resolvable:$false] %s2957_s26 }
  0xdb   : > { %2702 = vmatmul.mubr.msk.f32.gmra.mrb[14].mxu1 %vm1010_vm0, %v3440_v20  ;;  %p2960_p0 = scmp.lt.s32.totalorder %s4105_s19, %s2958_s26 }
  0xdc   : > { %v494_v29 = vpop.permute.xlu1 %493  ;;  %880 = vrot.lane.b32.xlu0 %v844_v24, %s3022_s28 }
  0xdd   : > { %v529_v60 = vmul.f32 %v494_v29, %v3399_v37 }
  0xde   : > { %720 = vrot.lane.b32.xlu1 %v684_v28, %s3023_s7 }
  0xe0   : > { %882 = vrot.lane.b32.xlu0 %v845_v31, %s3022_s28 }
  0xe1   : > { %v806_v33 = vpop.permute.xlu1 %805 }
  0xe2   : > { %722 = vrot.lane.b32.xlu1 %v685_v32, %s3023_s7  ;;  %v847_v47 = vmul.f32 %v806_v33, %v3370_v36  ;;  %v826_v33 = vpop.permute.xlu0 %825 }
  0xe4   : > { %422 = vperm.xlu0 %2950, %v3187_v12  }
  0xe6   : > { %v654_v38 = vpop.permute.xlu1 %653  ;;  %564 = vrot.lane.b32.xlu1 %v526_v35, %s3021_s27  ;;  %v690_v35 = vmul.f32 %v3292_v43, %v3403_v54 }
  0xe7   : > { %v689_v24 = vmul.f32 %v654_v38, %v3399_v37 }
  0xe8   : > { %427 = vperm.xlu0 %2950, %v3242_v19  }
  0xea   : > { %566 = vrot.lane.b32.xlu1 %v527_v39, %s3021_s27 }
  0xeb   : > { %v498_v44 = vpop.permute.xlu1 %497 }
  0xec   : > { %884 = vrot.lane.b32.xlu0 %v846_v42, %s3022_s28  ;;  %v530_v28 = vmul.f32 %v498_v44, %v3403_v54  ;;  %v838_v42 = vpop.permute.xlu0 %837 }
  0xee   : > { %724 = vrot.lane.b32.xlu1 %v686_v45, %s3023_s7  ;;  %v852_v45 = vmul.f32 %v826_v33, %v3416_v58 }
  0xef   : > { %v502_v49 = vpop.permute.xlu1 %501 }
  0xf0   : > { %886 = vrot.lane.b32.xlu0 %v847_v47, %s3022_s28  ;;  %v531_v31 = vmul.f32 %v502_v49, %v3412_v56  ;;  %v3471_v43 = vpop.permute.xlu0 %372 }
  0xf2   : > { %726 = vrot.lane.b32.xlu1 %v687_v51, %s3023_s7  ;;  %v692_v51 = vmul.f32 %v3302_v48, %v3416_v58  ;;  %v694_v48 = vmul.f32 %v3311_v52, %v3429_v62 }
  0xf4   : > { %v814_v57 = vpop.permute.xlu1 %813  ;;  %432 = vperm.xlu0 %2950, %v3193_v13  }
  0xf5   : > { %v849_v21 = vmul.f32 %v814_v57, %v3399_v37  ;;  %v3477_v57 = vpop.permute.xlu0 %387 }
  0xf6   : > { %568 = vrot.lane.b32.xlu1 %v528_v55, %s3021_s27 }
  0xf8   : > { %437 = vperm.xlu0 %2950, %v3220_v16  }
  0xf9   : > { %v662_v13 = vpop.permute.xlu1 %661 }
  0xfa   : > { %570 = vrot.lane.b32.xlu1 %v529_v60, %s3021_s27  ;;  %v691_v40 = vmul.f32 %v662_v13, %v3412_v56 }
  0xfc   : > { %888 = vrot.lane.b32.xlu0 %v848_v0, %s3022_s28 }
  0xfd   : > { %2951 = vset.pattern.permute.xlu0 %v3019_v5  ;;  %v850_v5 = vmul.f32 %v818_v26, %v3403_v54 }
  0xfe   : > { %v506_v23 = vpop.permute.xlu1 %505  ;;  %728 = vrot.lane.b32.xlu1 %v688_v1, %s3023_s7 }
  0xff   : > { %v532_v41 = vmul.f32 %v506_v23, %v3416_v58  ;;  %v855_v23 = vmul.f32 %v838_v42, %v3440_v20 }
 0x100   : > { %890 = vrot.lane.b32.xlu0 %v849_v21, %s3022_s28 }
 0x102   : > { %v510_v25 = vpop.permute.xlu1 %509  ;;  %730 = vrot.lane.b32.xlu1 %v689_v24, %s3023_s7 }
 0x103   : > { %v533_v47 = vmul.f32 %v510_v25, %v3426_v61 }
 0x104   : > { %734 = vrot.lane.b32.xlu0 %v691_v40, %s3023_s7 }
 0x106   : > { %572 = vrot.lane.b32.xlu1 %v530_v28, %s3021_s27 }
 0x107   : > { %v822_v29 = vpop.permute.xlu1 %821 }
 0x108   : > { %892 = vrot.lane.b32.xlu0 %v850_v5, %s3022_s28  ;;  %v851_v32 = vmul.f32 %v822_v29, %v3412_v56 }
 0x10a   : > { %574 = vrot.lane.b32.xlu1 %v531_v31, %s3021_s27 }
 0x10c   : > { %v670_v38 = vpop.permute.xlu1 %669  ;;  %894 = vrot.lane.b32.xlu0 %v851_v32, %s3022_s28 }
 0x10d   : > { %v693_v39 = vmul.f32 %v670_v38, %v3426_v61 }
 0x10e   : > { %732 = vrot.lane.b32.xlu1 %v690_v35, %s3023_s7 }
 0x110   : > { %738 = vrot.lane.b32.xlu0 %v693_v39, %s3023_s7 }
 0x111   : > { %v514_v44 = vpop.permute.xlu1 %513 }
 0x112   : > { %576 = vrot.lane.b32.xlu1 %v532_v41, %s3021_s27  ;;  %v534_v60 = vmul.f32 %v514_v44, %v3429_v62 }
 0x114   : > { %896 = vrot.lane.b32.xlu0 %v852_v45, %s3022_s28  ;;  %v555_v21 = vpop.permute.xlu0 %554 }
 0x115   : > { %v518_v49 = vpop.permute.xlu1 %517 }
 0x116   : > { %578 = vrot.lane.b32.xlu1 %v533_v47, %s3021_s27  ;;  %v535_v0 = vmul.f32 %v518_v49, %v3440_v20 }
 0x11a   : > { %v830_v55 = vpop.permute.xlu1 %829  ;;  %736 = vrot.lane.b32.xlu1 %v692_v51, %s3023_s7 }
 0x11b   : > { %v853_v59 = vmul.f32 %v830_v55, %v3426_v61 }
 0x11d   : > { %898 = vrot.lane.b32.xlu0 %v853_v59, %s3022_s28 }
 0x11e   : > { %580 = vrot.lane.b32.xlu1 %v534_v60, %s3021_s27 }
 0x11f   : > { %v678_v13 = vpop.permute.xlu1 %677 }
 0x120   : > { %v695_v1 = vmul.f32 %v678_v13, %v3440_v20 }
 0x122   : > { %582 = vrot.lane.b32.xlu1 %v535_v0, %s3021_s27  ;;  %742 = vrot.lane.b32.xlu0 %v695_v1, %s3023_s7  ;;  %v442_v1 = vmul.f32 %v3471_v43, %v3305_v50 }
 0x124   : > { %v834_v24 = vpop.permute.xlu1 %833 }
 0x125   : > { %v3490_v40 = vpop.permute.xlu0 %392  ;;  %v854_v25 = vmul.f32 %v834_v24, %v3429_v62 }
 0x126   : > { %740 = vrot.lane.b32.xlu1 %v694_v48, %s3023_s7  ;;  %902 = vrot.lane.b32.xlu0 %v855_v23, %s3022_s28 }
 0x129   : > { %v363_v26 = vpop.permute.xlu1 %362  ;;  %v3498_v28 = vpop.permute.xlu0 %397 }
 0x12a   : > { %900 = vrot.lane.b32.xlu1 %v854_v25, %s3022_s28  ;;  %1456 = vrot.lane.b32.xlu0 %v3262_v22, %s3021_s27  ;;  %v440_v35 = vmul.f32 %v363_v26, %v3274_v30 }
 0x12d   : > { %v368_v52 = vpop.permute.xlu1 %367  ;;  %v873_v5 = vpop.permute.xlu0 %872 }
 0x12e   : > { %1454 = vrot.lane.b32.xlu1 %v3274_v30, %s3021_s27  ;;  %1460 = vrot.lane.b32.xlu0 %v3314_v53, %s3021_s27  ;;  %v441_v38 = vmul.f32 %v368_v52, %v3262_v22 }
 0x130   : > { %v601_v45 = vadd.f32 %v555_v21, %v441_v38 }
 0x131   : > { %v378_v29 = vpop.permute.xlu1 %377  ;;  %v875_v32 = vpop.permute.xlu0 %874 }
 0x132   : > { %1458 = vrot.lane.b32.xlu1 %v3305_v50, %s3021_s27  ;;  %1464 = vrot.lane.b32.xlu0 %v3333_v17, %s3021_s27  ;;  %v443_v23 = vmul.f32 %v378_v29, %v3314_v53 }
 0x135   : > { %v383_v31 = vpop.permute.xlu1 %382  ;;  %v3518_v41 = vpop.permute.xlu0 %402 }
 0x136   : > { %1462 = vrot.lane.b32.xlu1 %v3327_v63, %s3021_s27  ;;  %1468 = vrot.lane.b32.xlu0 %v3370_v36, %s3021_s27 }
 0x139   : > { %v553_v33 = vpop.permute.xlu1 %552  ;;  %v3528_v55 = vpop.permute.xlu0 %407 }
 0x13a   : > { %1466 = vrot.lane.b32.xlu1 %v3364_v34, %s3021_s27  ;;  %1472 = vrot.lane.b32.xlu0 %v3399_v37, %s3021_s27  ;;  %v600_v39 = vadd.f32 %v553_v33, %v440_v35  ;;  %v444_v35 = vmul.f32 %v383_v31, %v3327_v63 }
 0x13d   : > { %v713_v42 = vpop.permute.xlu1 %712 }
 0x13e   : > { %v760_v44 = vadd.f32 %v713_v42, %v600_v39  ;;  %1470 = vrot.lane.b32.xlu1 %v3389_v46, %s3021_s27  ;;  %1476 = vrot.lane.b32.xlu0 %v3412_v56, %s3021_s27  ;;  %v877_v13 = vpop.permute.xlu0 %876 }
 0x140   : > { %v920_v47 = vadd.f32 %v873_v5, %v760_v44  ;;  %v445_v44 = vmul.f32 %v3477_v57, %v3333_v17 }
 0x141   : > { %v715_v49 = vpop.permute.xlu1 %714 }
 0x142   : > { %v761_v51 = vadd.f32 %v715_v49, %v601_v45  ;;  %1474 = vrot.lane.b32.xlu1 %v3403_v54, %s3021_s27  ;;  %1480 = vrot.lane.b32.xlu0 %v3426_v61, %s3021_s27  ;;  %v879_v25 = vpop.permute.xlu0 %878 }
 0x143   : > { %2652 = vmatprep.mubr.msk.f32.mxu0 %vm1010_vm0, %v920_v47 }
 0x144   : > { %v921_v59 = vadd.f32 %v875_v32, %v761_v51 }
 0x145   : > { %v557_v60 = vpop.permute.xlu1 %556 }
 0x146   : > { %1478 = vrot.lane.b32.xlu1 %v3416_v58, %s3021_s27  ;;  %1484 = vrot.lane.b32.xlu0 %v3440_v20, %s3021_s27  ;;  %v602_v21 = vadd.f32 %v557_v60, %v442_v1  ;;  %v446_v60 = vmul.f32 %v3490_v40, %v3364_v34 }
 0x147   : > { %2653 = vmatmul.mubr.msk.f32.vlgmr.msra.gmra.mrb[0].mxu0 %vm1010_vm0, %v921_v59 }
 0x148   : > { %2834 = vmatpush3.bf16.msra.mxu0 %v3346_v27 }
 0x149   : > { %v559_v0 = vpop.permute.xlu1 %558  ;;  %2840 = vmatprep.subr.bf16.mxu0 %v3346_v27 }
 0x14a   : > { %1482 = vrot.lane.b32.xlu1 %v3429_v62, %s3021_s27  ;;  %1713 = vrot.lane.b32.xlu0 %v3262_v22, %s3023_s7  ;;  %v603_v26 = vadd.f32 %v559_v0, %v443_v23  ;;  %s2959_s27 = scalar_lea.vmem %s2958_s26, 32 }
 0x14d   : > { %v717_v48 = vpop.permute.xlu1 %716 }
 0x14e   : > { %v762_v24 = vadd.f32 %v717_v48, %v602_v21  ;;  %1711 = vrot.lane.b32.xlu1 %v3274_v30, %s3023_s7  ;;  %1970 = vrot.lane.b32.xlu0 %v3262_v22, %s3022_s28  ;;  %v447_v21 = vmul.f32 %v3498_v28, %v3370_v36 }
 0x150   : > { %v922_v43 = vadd.f32 %v877_v13, %v762_v24 }
 0x151   : > { %v719_v52 = vpop.permute.xlu1 %718 }
 0x152   : > { %v763_v5 = vadd.f32 %v719_v52, %v603_v26  ;;  %1968 = vrot.lane.b32.xlu1 %v3274_v30, %s3022_s28  ;;  %1717 = vrot.lane.b32.xlu0 %v3314_v53, %s3023_s7 }
 0x153   : > { %2655 = vmatprep.mubr.msk.f32.mxu0 %vm1010_vm0, %v922_v43  ;;  %v3554_v29 = vpop.permute.xlu0 %412 }
 0x154   : > { %v923_v32 = vadd.f32 %v879_v25, %v763_v5  ;;  %v448_v5 = vmul.f32 %v3518_v41, %v3389_v46 }
 0x155   : > { %v561_v33 = vpop.permute.xlu1 %560 }
 0x156   : > { %1715 = vrot.lane.b32.xlu1 %v3305_v50, %s3023_s7  ;;  %1974 = vrot.lane.b32.xlu0 %v3314_v53, %s3022_s28  ;;  %v604_v39 = vadd.f32 %v561_v33, %v444_v35  ;;  %v449_v35 = vmul.f32 %v3528_v55, %v3399_v37 }
 0x157   : > { %2656 = vmatmul.mubr.msk.f32.gmra.mrb[2].mxu0 %vm1010_vm0, %v923_v32  ;;  %v3561_v22 = vpop.permute.xlu0 %417 }
 0x159   : > { %v563_v30 = vpop.permute.xlu1 %562 }
 0x15a   : > { %1972 = vrot.lane.b32.xlu1 %v3305_v50, %s3022_s28  ;;  %1721 = vrot.lane.b32.xlu0 %v3333_v17, %s3023_s7  ;;  %v605_v45 = vadd.f32 %v563_v30, %v445_v44 }
 0x15b   : > { %v881_v38 = vpop.permute.xlu0 %880 }
 0x15d   : > { %v721_v42 = vpop.permute.xlu1 %720 }
 0x15e   : > { %v764_v53 = vadd.f32 %v721_v42, %v604_v39  ;;  %1719 = vrot.lane.b32.xlu1 %v3327_v63, %s3023_s7  ;;  %1978 = vrot.lane.b32.xlu0 %v3333_v17, %s3022_s28 }
 0x15f   : > { %v883_v31 = vpop.permute.xlu0 %882 }
 0x160   : > { %v924_v47 = vadd.f32 %v881_v38, %v764_v53 }
 0x161   : > { %v723_v50 = vpop.permute.xlu1 %722 }
 0x162   : > { %v765_v49 = vadd.f32 %v723_v50, %v605_v45  ;;  %1976 = vrot.lane.b32.xlu1 %v3327_v63, %s3022_s28  ;;  %1725 = vrot.lane.b32.xlu0 %v3370_v36, %s3023_s7  ;;  %v451_v45 = vmul.f32 %v3561_v22, %v3412_v56  ;;  %v450_v50 = vmul.f32 %v3554_v29, %v3403_v54 }
 0x163   : > { %2658 = vmatprep.mubr.msk.f32.mxu0 %vm1010_vm0, %v924_v47  ;;  %v3579_v57 = vpop.permute.xlu0 %422 }
 0x164   : > { %v925_v51 = vadd.f32 %v883_v31, %v765_v49  ;;  %v452_v22 = vmul.f32 %v3579_v57, %v3416_v58 }
 0x165   : > { %v565_v59 = vpop.permute.xlu1 %564 }
 0x166   : > { %1723 = vrot.lane.b32.xlu1 %v3364_v34, %s3023_s7  ;;  %1982 = vrot.lane.b32.xlu0 %v3370_v36, %s3022_s28  ;;  %v606_v0 = vadd.f32 %v565_v59, %v446_v60 }
 0x167   : > { %2659 = vmatmul.mubr.msk.f32.gmra.mrb[4].mxu0 %vm1010_vm0, %v925_v51  ;;  %v3586_v17 = vpop.permute.xlu0 %427 }
 0x169   : > { %v567_v63 = vpop.permute.xlu1 %566 }
 0x16a   : > { %1980 = vrot.lane.b32.xlu1 %v3364_v34, %s3022_s28  ;;  %1729 = vrot.lane.b32.xlu0 %v3399_v37, %s3023_s7  ;;  %v607_v23 = vadd.f32 %v567_v63, %v447_v21 }
 0x16b   : > { %v885_v13 = vpop.permute.xlu0 %884 }
 0x16d   : > { %v725_v1 = vpop.permute.xlu1 %724 }
 0x16e   : > { %v766_v48 = vadd.f32 %v725_v1, %v606_v0  ;;  %1727 = vrot.lane.b32.xlu1 %v3389_v46, %s3023_s7  ;;  %1986 = vrot.lane.b32.xlu0 %v3399_v37, %s3022_s28 }
 0x16f   : > { %v887_v40 = vpop.permute.xlu0 %886 }
 0x170   : > { %v926_v24 = vadd.f32 %v885_v13, %v766_v48 }
 0x171   : > { %v727_v34 = vpop.permute.xlu1 %726 }
 0x172   : > { %v767_v25 = vadd.f32 %v727_v34, %v607_v23  ;;  %1984 = vrot.lane.b32.xlu1 %v3389_v46, %s3022_s28  ;;  %1733 = vrot.lane.b32.xlu0 %v3412_v56, %s3023_s7 }
 0x173   : > { %2661 = vmatprep.mubr.msk.f32.mxu0 %vm1010_vm0, %v926_v24  ;;  %v3605_v36 = vpop.permute.xlu0 %432 }
 0x174   : > { %v927_v28 = vadd.f32 %v887_v40, %v767_v25 }
 0x175   : > { %v569_v26 = vpop.permute.xlu1 %568 }
 0x176   : > { %1731 = vrot.lane.b32.xlu1 %v3403_v54, %s3023_s7  ;;  %1990 = vrot.lane.b32.xlu0 %v3412_v56, %s3022_s28  ;;  %v608_v33 = vadd.f32 %v569_v26, %v448_v5 }
 0x177   : > { %2662 = vmatmul.mubr.msk.f32.gmra.mrb[6].mxu0 %vm1010_vm0, %v927_v28  ;;  %v438_v43 = vpop.permute.xlu0 %437 }
 0x179   : > { %v571_v52 = vpop.permute.xlu1 %570 }
 0x17a   : > { %1988 = vrot.lane.b32.xlu1 %v3403_v54, %s3022_s28  ;;  %1737 = vrot.lane.b32.xlu0 %v3426_v61, %s3023_s7  ;;  %v609_v41 = vadd.f32 %v571_v52, %v449_v35  ;;  %v453_v54 = vmul.f32 %v3586_v17, %v3426_v61  ;;  %v454_v35 = vmul.f32 %v3605_v36, %v3429_v62 }
 0x17b   : > { %v889_v32 = vpop.permute.xlu0 %888 }
 0x17d   : > { %v729_v30 = vpop.permute.xlu1 %728 }
 0x17e   : > { %v768_v38 = vadd.f32 %v729_v30, %v608_v33  ;;  %1735 = vrot.lane.b32.xlu1 %v3416_v58, %s3023_s7  ;;  %1994 = vrot.lane.b32.xlu0 %v3426_v61, %s3022_s28  ;;  %v455_v61 = vmul.f32 %v438_v43, %v3440_v20 }
 0x17f   : > { %v891_v46 = vpop.permute.xlu0 %890 }
 0x180   : > { %v928_v39 = vadd.f32 %v889_v32, %v768_v38 }
 0x181   : > { %v731_v42 = vpop.permute.xlu1 %730 }
 0x182   : > { %v769_v44 = vadd.f32 %v731_v42, %v609_v41  ;;  %1992 = vrot.lane.b32.xlu1 %v3416_v58, %s3022_s28  ;;  %1741 = vrot.lane.b32.xlu0 %v3440_v20, %s3023_s7  ;;  %v940_v58 = vsel %vm936_vm1, %v3143_v3, 0.0  ;;  %v943_v41 = vsel %vm936_vm1, %v3148_v4, 0.0  ;;  %v949_v3 = vsel %vm936_vm1, %v3163_v7, 0.0 }
 0x183   : > { %2664 = vmatprep.mubr.msk.f32.mxu0 %vm1010_vm0, %v928_v39  ;;  %v735_v37 = vpop.permute.xlu0 %734  ;;  %v955_v4 = vsel %vm936_vm1, %v3168_v8, 0.0  ;;  %v946_v7 = vsel %vm936_vm1, %v3154_v6, 0.0  ;;  %v3674_v6 = vpop.f32.mrb[0].mxu1 }
 0x184   : > { %v929_v55 = vadd.f32 %v891_v46, %v769_v44 }
 0x185   : > { %v573_v53 = vpop.permute.xlu1 %572 }
 0x186   : > { %1739 = vrot.lane.b32.xlu1 %v3429_v62, %s3023_s7  ;;  %1998 = vrot.lane.b32.xlu0 %v3440_v20, %s3022_s28  ;;  %v610_v59 = vadd.f32 %v573_v53, %v450_v50  ;;  %v967_v50 = vsel %vm936_vm1, %v3181_v11, 0.0  ;;  %v973_v11 = vsel %vm936_vm1, %v3187_v12, 0.0  ;;  %v970_v12 = vsel %vm936_vm1, %v3232_v18, 0.0 }
 0x187   : > { %2665 = vmatmul.mubr.msk.f32.gmra.mrb[8].mxu0 %vm1010_vm0, %v929_v55  ;;  %v893_v31 = vpop.permute.xlu0 %892  ;;  %v937_v55 = vsel %vm936_vm1, %v3138_v2, 0.0  ;;  %v961_v2 = vsel %vm936_vm1, %v3176_v10, 0.0  ;;  %v958_v10 = vsel %vm936_vm1, %v3199_v14, 0.0  ;;  %v964_v14 = vsel %vm936_vm1, %v3215_v15, 0.0 }
 0x188   : > { %v982_v18 = vsel %vm936_vm1, %v3220_v16, 0.0 }
 0x189   : > { %v575_v47 = vpop.permute.xlu1 %574 }
 0x18a   : > { %v611_v49 = vadd.f32 %v575_v47, %v451_v45  ;;  %1996 = vrot.lane.b32.xlu1 %v3429_v62, %s3022_s28  ;;  %v952_v45 = vsel %vm936_vm1, %v3172_v9, 0.0 }
 0x18b   : > { %v895_v51 = vpop.permute.xlu0 %894 }
 0x18c   : > { %v771_v63 = vadd.f32 %v735_v37, %v611_v49  ;;  %v3681_v49 = vpop.f32.mrb[1].mxu1 }
 0x18d   : > { %v733_v60 = vpop.permute.xlu1 %732  ;;  %v3683_v9 = vpop.f32.mrb[2].mxu1 }
 0x18e   : > { %v770_v13 = vadd.f32 %v733_v60, %v610_v59  ;;  %v931_v21 = vadd.f32 %v895_v51, %v771_v63  ;;  %v3686_v59 = vpop.f32.mrb[3].mxu1 }
 0x18f   : > { %v739_v0 = vpop.permute.xlu0 %738  ;;  %v3693_v60 = vpop.f32.mrb[4].mxu1 }
 0x190   : > { %v930_v1 = vadd.f32 %v893_v31, %v770_v13 }
 0x191   : > { %v577_v48 = vpop.permute.xlu1 %576 }
 0x192   : > { %2667 = vmatprep.mubr.msk.f32.mxu0 %vm1010_vm0, %v930_v1  ;;  %v612_v24 = vadd.f32 %v577_v48, %v452_v22  ;;  %v2952_v1 = vld [vmem:[%s3135_s23 + $0x70] sm:$0xff]  ;;  %s2953_s23 = scalar_lea.vmem %s4105_s19, 16 }
 0x193   : > { %2668 = vmatmul.mubr.msk.f32.gmra.mrb[10].mxu0 %vm1010_vm0, %v931_v21  ;;  %v897_v56 = vpop.permute.xlu0 %896  ;;  %v979_v21 = vsel %vm936_vm1, %v2952_v1, 0.0  ;;  %v3024_v1 = vmov 0.0|0.0   ;;  %p2954_p11 = scmp.ne.s32.totalorder %s4105_s19, %s2953_s23  ;;  %p2961_p1 = scmp.lt.s32.totalorder %s2959_s27, %s2953_s23 }
 0x194   : > { %2843 = vmatprep.subr.bf16.mxu1 %v3024_v1 }
 0x195   : > { %v579_v29 = vpop.permute.xlu1 %578  ;;  %p2955_p12 = pnand %p2954_p11, %p3111_p5  ;;  %p2962_p2 = por %p2961_p1, %p2960_p0 }
 0x196   : > { %v613_v40 = vadd.f32 %v579_v29, %v453_v54  ;;  %v976_v54 = vsel %vm936_vm1, %v3242_v19, 0.0 }
 0x197   : > { %v899_v23 = vpop.permute.xlu0 %898  ;;  %p2956_p13 = pneg %p2955_p12 }
 0x198   : > { %v773_v34 = vadd.f32 %v739_v0, %v613_v40  ;;  %v3696_v0 = vpop.f32.mrb[5].mxu1 }
 0x199   : > { %v737_v25 = vpop.permute.xlu1 %736  ;;  %p2963_p3 = pnand %p2962_p2, %p2956_p13 }
 0x19a   : > { %v772_v28 = vadd.f32 %v737_v25, %v612_v24  ;;  %v933_v5 = vadd.f32 %v899_v23, %v773_v34  ;;  %v3713_v23 = vpop.f32.mrb[6].mxu1 }
 0x19b   : > { %v743_v26 = vpop.permute.xlu0 %742  ;;  %v3715_v19 = vpop.f32.mrb[7].mxu1 }
 0x19c   : > { %v932_v52 = vadd.f32 %v897_v56, %v772_v28 }
 0x19d   : > { %v581_v32 = vpop.permute.xlu1 %580 }
 0x19e   : > { %2670 = vmatprep.mubr.msk.f32.mxu0 %vm1010_vm0, %v932_v52  ;;  %v614_v46 = vadd.f32 %v581_v32, %v454_v35  ;;  %v3725_v32 = vpop.f32.mrb[8].mxu1 }
 0x19f   : > { %2671 = vmatmul.mubr.msk.f32.gmra.mrb[12].mxu0 %vm1010_vm0, %v933_v5  ;;  %v903_v33 = vpop.permute.xlu0 %902 }
 0x1a1   : > { %v583_v17 = vpop.permute.xlu1 %582 }
 0x1a2   : > { %v615_v57 = vadd.f32 %v583_v17, %v455_v61  ;;  %v3728_v61 = vpop.f32.mrb[9].mxu1 }
 0x1a3   : > { %v1457_v30 = vpop.permute.xlu0 %1456 }
 0x1a4   : > { %v775_v39 = vadd.f32 %v743_v26, %v615_v57 }
 0x1a5   : > { %v741_v38 = vpop.permute.xlu1 %740  ;;  %941 = vadd.xlane.f32.xlu0 %v940_v58 }
 0x1a6   : > { %v774_v44 = vadd.f32 %v741_v38, %v614_v46  ;;  %v935_v43 = vadd.f32 %v903_v33, %v775_v39  ;;  %v3736_v46 = vpop.f32.mrb[10].mxu1 }
 0x1a7   : > { %v1461_v42 = vpop.permute.xlu0 %1460 }
 0x1a9   : > { %v901_v37 = vpop.permute.xlu1 %900  ;;  %944 = vadd.xlane.f32.xlu0 %v943_v41  ;;  %v3738_v41 = vpop.f32.mrb[11].mxu1 }
 0x1aa   : > { %v934_v20 = vadd.f32 %v901_v37, %v774_v44 }
 0x1ab   : > { %v1465_v62 = vpop.permute.xlu0 %1464 }
 0x1ac   : > { %2673 = vmatprep.mubr.msk.f32.mxu0 %vm1010_vm0, %v934_v20 }
 0x1ad   : > { %v1455_v36 = vpop.permute.xlu1 %1454  ;;  %950 = vadd.xlane.f32.xlu0 %v949_v3  ;;  %2674 = vmatmul.mubr.msk.f32.gmra.mrb[14].mxu0 %vm1010_vm0, %v935_v43  ;;  %v3746_v3 = vpop.f32.mrb[12].mxu1 }
 0x1ae   : > { %2708 = vmatprep.mubr.msk.f32.mxu0 %vm1010_vm0, %v1455_v36  ;;  %938 = vadd.xlane.f32.xlu1 %v937_v55  ;;  %v3748_v43 = vpop.f32.mrb[13].mxu1 }
 0x1af   : > { %v1469_v53 = vpop.permute.xlu0 %1468 }
 0x1b1   : > { %v1459_v31 = vpop.permute.xlu1 %1458  ;;  %2709 = vmatmul.mubr.msk.f32.vlgmr.msra.gmra.mrb[16].mxu0 %vm1010_vm0, %v1457_v30  ;;  %956 = vadd.xlane.f32.xlu0 %v955_v4 }
 0x1b2   : > { %2711 = vmatprep.mubr.msk.f32.mxu0 %vm1010_vm0, %v1459_v31  ;;  %947 = vadd.xlane.f32.xlu1 %v946_v7  ;;  %v3756_v31 = vpop.f32.mrb[14].mxu1 }
 0x1b3   : > { %2842 = vmatpush3.bf16.msra.mxu0 %v3346_v27  ;;  %v1473_v8 = vpop.permute.xlu0 %1472 }
 0x1b5   : > { %v1463_v47 = vpop.permute.xlu1 %1462  ;;  %2712 = vmatmul.mubr.msk.f32.gmra.mrb[18].mxu0 %vm1010_vm0, %v1461_v42  ;;  %962 = vadd.xlane.f32.xlu0 %v961_v2 }
 0x1b6   : > { %2714 = vmatprep.mubr.msk.f32.mxu0 %vm1010_vm0, %v1463_v47  ;;  %953 = vadd.xlane.f32.xlu1 %v952_v45  ;;  %v3759_v45 = vpop.f32.mrb[15].mxu1 }
 0x1b7   : > { %v1477_v27 = vpop.permute.xlu0 %1476 }
 0x1b9   : > { %v1467_v51 = vpop.permute.xlu1 %1466  ;;  %2715 = vmatmul.mubr.msk.f32.gmra.mrb[20].mxu0 %vm1010_vm0, %v1465_v62  ;;  %968 = vadd.xlane.f32.xlu0 %v967_v50 }
 0x1ba   : > { %2717 = vmatprep.mubr.msk.f32.mxu0 %vm1010_vm0, %v1467_v51  ;;  %959 = vadd.xlane.f32.xlu1 %v958_v10 }
 0x1bb   : > { %v1481_v63 = vpop.permute.xlu0 %1480 }
 0x1bd   : > { %v1471_v13 = vpop.permute.xlu1 %1470  ;;  %2718 = vmatmul.mubr.msk.f32.gmra.mrb[22].mxu0 %vm1010_vm0, %v1469_v53  ;;  %974 = vadd.xlane.f32.xlu0 %v973_v11 }
 0x1be   : > { %2720 = vmatprep.mubr.msk.f32.mxu0 %vm1010_vm0, %v1471_v13  ;;  %965 = vadd.xlane.f32.xlu1 %v964_v14  ;;  %v3774_v14 = vld [vmem:[%s4150_s5] ss:$0 sm:$0xff] }
 0x1bf   : > { %v1485_v48 = vpop.permute.xlu0 %1484 }
 0x1c1   : > { %v1475_v56 = vpop.permute.xlu1 %1474  ;;  %2721 = vmatmul.mubr.msk.f32.gmra.mrb[24].mxu0 %vm1010_vm0, %v1473_v8  ;;  %980 = vadd.xlane.f32.xlu0 %v979_v21 }
 0x1c2   : > { %2723 = vmatprep.mubr.msk.f32.mxu0 %vm1010_vm0, %v1475_v56  ;;  %971 = vadd.xlane.f32.xlu1 %v970_v12 }
 0x1c3   : > { %v1714_v15 = vpop.permute.xlu0 %1713 }
 0x1c5   : > { %v1479_v29 = vpop.permute.xlu1 %1478  ;;  %2724 = vmatmul.mubr.msk.f32.gmra.mrb[26].mxu0 %vm1010_vm0, %v1477_v27 }
 0x1c6   : > { %2726 = vmatprep.mubr.msk.f32.mxu0 %vm1010_vm0, %v1479_v29  ;;  %977 = vadd.xlane.f32.xlu1 %v976_v54  ;;  %v1338_v29 = vadd.f32 %v3774_v14, %v3686_v59 }
 0x1c7   : > { %v1971_v22 = vpop.permute.xlu0 %1970 }
 0x1c9   : > { %v1483_v40 = vpop.permute.xlu1 %1482  ;;  %2727 = vmatmul.mubr.msk.f32.gmra.mrb[28].mxu0 %vm1010_vm0, %v1481_v63  ;;  %v3769_v63 = vld [vmem:[%s4148_s3] ss:$0 sm:$0xff] }
 0x1ca   : > { %2729 = vmatprep.mubr.msk.f32.mxu0 %vm1010_vm0, %v1483_v40  ;;  %983 = vadd.xlane.f32.xlu1 %v982_v18 }
 0x1cb   : > { %v1718_v24 = vpop.permute.xlu0 %1717 }
 0x1cd   : > { %v1712_v34 = vpop.permute.xlu1 %1711  ;;  %2730 = vmatmul.mubr.msk.f32.gmra.mrb[30].mxu0 %vm1010_vm0, %v1485_v48  ;;  %v1333_v48 = vadd.f32 %v3674_v6, %v3774_v14 }
 0x1ce   : > { %2736 = vmatprep.mubr.msk.f32.mxu1 %vm1010_vm0, %v1712_v34 }
 0x1cf   : > { %2737 = vmatmul.mubr.msk.f32.vlgmr.msra.gmra.mrb[16].mxu1 %vm1010_vm0, %v1714_v15  ;;  %v1975_v25 = vpop.permute.xlu0 %1974 }
 0x1d1   : > { %v1969_v16 = vpop.permute.xlu1 %1968 }
 0x1d2   : > { %2764 = vmatprep.mubr.msk.f32.mxu0 %vm1010_vm0, %v1969_v16  ;;  %v1348_v16 = vadd.f32 %v3774_v14, %v3696_v0 }
 0x1d3   : > { %2765 = vmatmul.mubr.msk.f32.vlgmr.msra.gmra.mrb[32].mxu0 %vm1010_vm0, %v1971_v22  ;;  %v1722_v28 = vpop.permute.xlu0 %1721 }
 0x1d5   : > { %v1716_v26 = vpop.permute.xlu1 %1715 }
 0x1d6   : > { %2739 = vmatprep.mubr.msk.f32.mxu1 %vm1010_vm0, %v1716_v26 }
 0x1d7   : > { %2740 = vmatmul.mubr.msk.f32.gmra.mrb[18].mxu1 %vm1010_vm0, %v1718_v24  ;;  %v1979_v52 = vpop.permute.xlu0 %1978 }
 0x1d9   : > { %v1973_v5 = vpop.permute.xlu1 %1972 }
 0x1da   : > { %2767 = vmatprep.mubr.msk.f32.mxu0 %vm1010_vm0, %v1973_v5 }
 0x1db   : > { %2768 = vmatmul.mubr.msk.f32.gmra.mrb[34].mxu0 %vm1010_vm0, %v1975_v25  ;;  %v1726_v33 = vpop.permute.xlu0 %1725 }
 0x1dd   : > { %v1720_v17 = vpop.permute.xlu1 %1719 }
 0x1de   : > { %2742 = vmatprep.mubr.msk.f32.mxu1 %vm1010_vm0, %v1720_v17  ;;  %v1343_v17 = vadd.f32 %v3683_v9, %v3774_v14 }
 0x1df   : > { %2743 = vmatmul.mubr.msk.f32.gmra.mrb[20].mxu1 %vm1010_vm0, %v1722_v28  ;;  %v1983_v58 = vpop.permute.xlu0 %1982  ;;  %v1328_v28 = vadd.f32 %v3774_v14, %v3681_v49 }
 0x1e1   : > { %v1977_v57 = vpop.permute.xlu1 %1976 }
 0x1e2   : > { %2770 = vmatprep.mubr.msk.f32.mxu0 %vm1010_vm0, %v1977_v57 }
 0x1e3   : > { %2771 = vmatmul.mubr.msk.f32.gmra.mrb[36].mxu0 %vm1010_vm0, %v1979_v52  ;;  %v1730_v30 = vpop.permute.xlu0 %1729 }
 0x1e5   : > { %v1724_v35 = vpop.permute.xlu1 %1723 }
 0x1e6   : > { %2745 = vmatprep.mubr.msk.f32.mxu1 %vm1010_vm0, %v1724_v35 }
 0x1e7   : > { %2746 = vmatmul.mubr.msk.f32.gmra.mrb[22].mxu1 %vm1010_vm0, %v1726_v33  ;;  %v1987_v38 = vpop.permute.xlu0 %1986 }
 0x1e9   : > { %v1981_v39 = vpop.permute.xlu1 %1980 }
 0x1ea   : > { %2773 = vmatprep.mubr.msk.f32.mxu0 %vm1010_vm0, %v1981_v39 }
 0x1eb   : > { %2774 = vmatmul.mubr.msk.f32.gmra.mrb[38].mxu0 %vm1010_vm0, %v1983_v58  ;;  %v1734_v42 = vpop.permute.xlu0 %1733 }
 0x1ed   : > { %v1728_v44 = vpop.permute.xlu1 %1727 }
 0x1ee   : > { %2748 = vmatprep.mubr.msk.f32.mxu1 %vm1010_vm0, %v1728_v44 }
 0x1ef   : > { %2749 = vmatmul.mubr.msk.f32.gmra.mrb[24].mxu1 %vm1010_vm0, %v1730_v30  ;;  %v1991_v37 = vpop.permute.xlu0 %1990  ;;  %v1353_v30 = vadd.f32 %v3693_v60, %v3774_v14 }
 0x1f1   : > { %v1985_v20 = vpop.permute.xlu1 %1984 }
 0x1f2   : > { %2776 = vmatprep.mubr.msk.f32.mxu0 %vm1010_vm0, %v1985_v20 }
 0x1f3   : > { %2777 = vmatmul.mubr.msk.f32.gmra.mrb[40].mxu0 %vm1010_vm0, %v1987_v38  ;;  %v1738_v62 = vpop.permute.xlu0 %1737 }
 0x1f5   : > { %v1732_v55 = vpop.permute.xlu1 %1731 }
 0x1f6   : > { %2751 = vmatprep.mubr.msk.f32.mxu1 %vm1010_vm0, %v1732_v55  ;;  %v1363_v55 = vadd.f32 %v3713_v23, %v3774_v14 }
 0x1f7   : > { %2752 = vmatmul.mubr.msk.f32.gmra.mrb[26].mxu1 %vm1010_vm0, %v1734_v42  ;;  %v1995_v4 = vpop.permute.xlu0 %1994 }
 0x1f9   : > { %v1989_v36 = vpop.permute.xlu1 %1988 }
 0x1fa   : > { %2779 = vmatprep.mubr.msk.f32.mxu0 %vm1010_vm0, %v1989_v36 }
 0x1fb   : > { %2780 = vmatmul.mubr.msk.f32.gmra.mrb[42].mxu0 %vm1010_vm0, %v1991_v37  ;;  %v1742_v2 = vpop.permute.xlu0 %1741 }
 0x1fd   : > { %v1736_v7 = vpop.permute.xlu1 %1735 }
 0x1fe   : > { %2754 = vmatprep.mubr.msk.f32.mxu1 %vm1010_vm0, %v1736_v7 }
 0x1ff   : > { %2755 = vmatmul.mubr.msk.f32.gmra.mrb[28].mxu1 %vm1010_vm0, %v1738_v62  ;;  %v1999_v47 = vpop.permute.xlu0 %1998  ;;  %v1358_v62 = vadd.f32 %v3774_v14, %v3715_v19  ;;  %v1373_v19 = vadd.f32 %v3725_v32, %v3774_v14 }
 0x201   : > { %v1993_v53 = vpop.permute.xlu1 %1992 }
 0x202   : > { %2782 = vmatprep.mubr.msk.f32.mxu0 %vm1010_vm0, %v1993_v53 }
 0x203   : > { %2783 = vmatmul.mubr.msk.f32.gmra.mrb[44].mxu0 %vm1010_vm0, %v1995_v4 }
 0x205   : > { %v1740_v8 = vpop.permute.xlu1 %1739 }
 0x206   : > { %2757 = vmatprep.mubr.msk.f32.mxu1 %vm1010_vm0, %v1740_v8 }
 0x207   : > { %2758 = vmatmul.mubr.msk.f32.gmra.mrb[30].mxu1 %vm1010_vm0, %v1742_v2 }
 0x209   : > { %v1997_v50 = vpop.permute.xlu1 %1996 }
 0x20a   : > { %2785 = vmatprep.mubr.msk.f32.mxu0 %vm1010_vm0, %v1997_v50 }
 0x20b   : > { %2786 = vmatmul.mubr.msk.f32.gmra.mrb[46].mxu0 %vm1010_vm0, %v1999_v47 }
 0x21a   : > { %v2654_v10 = vpop.f32.mrb[0].mxu0 }
 0x21b   : > { %v1125_v27 = vpop.f32.mrb[1].mxu0 }
 0x22a   : > { %v2657_v51 = vpop.f32.mrb[2].mxu0 }
 0x22b   : > { %v1135_v11 = vpop.f32.mrb[3].mxu0 }
 0x232   : > { %v942_v13 = vpop.xlane.xlu0 %941 }
 0x233   : > { %v995_v21 = vmul.f32 %v3769_v63, %v942_v13 }
 0x235   : > { %v3780_v12 = vadd.f32 %v2654_v10, %v995_v21 }
 0x236   : > { %v945_v56 = vpop.xlane.xlu0 %944 }
 0x237   : > { %v3783_v15 = vadd.f32 %v1333_v48, %v3780_v12  ;;  %v996_v54 = vmul.f32 %v3769_v63, %v945_v56 }
 0x239   : > { %v3788_v22 = vadd.f32 %v1135_v11, %v996_v54 }
 0x23a   : > { %v2660_v18 = vpop.f32.mrb[4].mxu0  ;;  %v951_v40 = vpop.xlane.xlu0 %950 }
 0x23b   : > { %v3791_v24 = vadd.f32 %v1338_v29, %v3788_v22  ;;  %v1145_v34 = vpop.f32.mrb[5].mxu0  ;;  %v998_v6 = vmul.f32 %v3769_v63, %v951_v40  ;;  %v939_v25 = vpop.xlane.xlu1 %938  ;;  %v1378_v40 = vadd.f32 %v3774_v14, %v3738_v41 }
 0x23c   : > { %v994_v26 = vmul.f32 %v3769_v63, %v939_v25 }
 0x23d   : > { %v3799_v59 = vadd.f32 %v1145_v34, %v998_v6 }
 0x23e   : > { %v3801_v52 = vadd.f32 %v1125_v27, %v994_v26  ;;  %v957_v39 = vpop.xlane.xlu0 %956  ;;  %v1368_v27 = vadd.f32 %v3774_v14, %v3728_v61  ;;  %v1383_v61 = vadd.f32 %v3736_v46, %v3774_v14  ;;  %v3026_v26 = vmov 0.0  }
 0x23f   : > { %v3804_v5 = vadd.f32 %v1348_v16, %v3799_v59  ;;  %v948_v33 = vpop.xlane.xlu1 %947  ;;  %v1000_v37 = vmul.f32 %v3769_v63, %v957_v39  ;;  %2820 = vmatprep.mubr.msk.f32.mxu1 %vm3025_vm2, %v3026_v26 }
 0x240   : > { %v997_v58 = vmul.f32 %v3769_v63, %v948_v33  ;;  %v3810_v0 = vadd.f32 %v1328_v28, %v3801_v52 }
 0x242   : > { %v3812_v57 = vadd.f32 %v2657_v51, %v997_v58  ;;  %v963_v47 = vpop.xlane.xlu0 %962  ;;  %v1393_v58 = vadd.f32 %v3746_v3, %v3774_v14 }
 0x243   : > { %v954_v49 = vpop.xlane.xlu1 %953  ;;  %v1002_v23 = vmul.f32 %v3769_v63, %v963_v47 }
 0x244   : > { %v999_v35 = vmul.f32 %v3769_v63, %v954_v49  ;;  %v3818_v38 = vadd.f32 %v1343_v17, %v3812_v57 }
 0x246   : > { %v3820_v42 = vadd.f32 %v2660_v18, %v999_v35  ;;  %v969_v54 = vpop.xlane.xlu0 %968 }
 0x247   : > { %v960_v9 = vpop.xlane.xlu1 %959  ;;  %v1004_v32 = vmul.f32 %v3769_v63, %v969_v54 }
 0x248   : > { %v1001_v44 = vmul.f32 %v3769_v63, %v960_v9  ;;  %v3825_v20 = vadd.f32 %v1353_v30, %v3820_v42  ;;  %v1388_v30 = vadd.f32 %v3774_v14, %v3748_v43  ;;  %v1403_v43 = vadd.f32 %v3756_v31, %v3774_v14 }
 0x24a   : > { %v2663_v60 = vpop.f32.mrb[6].mxu0  ;;  %v975_v46 = vpop.xlane.xlu0 %974 }
 0x24b   : > { %v3831_v36 = vadd.f32 %v2663_v60, %v1001_v44  ;;  %v1155_v4 = vpop.f32.mrb[7].mxu0  ;;  %v966_v8 = vpop.xlane.xlu1 %965  ;;  %v1006_v41 = vmul.f32 %v3769_v63, %v975_v46 }
 0x24c   : > { %v3833_v7 = vadd.f32 %v1155_v4, %v1000_v37  ;;  %v1003_v50 = vmul.f32 %v3769_v63, %v966_v8  ;;  %v1398_v8 = vadd.f32 %v3774_v14, %v3759_v45 }
 0x24d   : > { %v3836_v53 = vadd.f32 %v1363_v55, %v3831_v36 }
 0x24e   : > { %v3839_v2 = vadd.f32 %v1358_v62, %v3833_v7  ;;  %v981_v60 = vpop.xlane.xlu0 %980 }
 0x24f   : > { %v972_v56 = vpop.xlane.xlu1 %971  ;;  %v1008_v3 = vmul.f32 %v3769_v63, %v981_v60 }
 0x250   : > { %v1005_v29 = vmul.f32 %v3769_v63, %v972_v56 }
 0x253   : > { %v978_v33 = vpop.xlane.xlu1 %977 }
 0x254   : > { %v1007_v17 = vmul.f32 %v3769_v63, %v978_v33 }
 0x257   : > { %v984_v55 = vpop.xlane.xlu1 %983 }
 0x258   : > { %v1009_v62 = vmul.f32 %v3769_v63, %v984_v55 }
 0x25a   : > { %v2666_v10 = vpop.f32.mrb[8].mxu0 }
 0x25b   : > { %v3847_v51 = vadd.f32 %v2666_v10, %v1003_v50  ;;  %v1165_v11 = vpop.f32.mrb[9].mxu0 }
 0x25c   : > { %v3849_v13 = vadd.f32 %v1165_v11, %v1002_v23 }
 0x25d   : > { %v3852_v21 = vadd.f32 %v1373_v19, %v3847_v51 }
 0x25e   : > { %v3855_v48 = vadd.f32 %v1368_v27, %v3849_v13 }
 0x266   : > { %v2669_v18 = vpop.f32.mrb[10].mxu0 }
 0x267   : > { %v3863_v34 = vadd.f32 %v2669_v18, %v1005_v29  ;;  %v1175_v6 = vpop.f32.mrb[11].mxu0  ;;  %v1423_v29 = vmax.f32 %v3783_v15, 0.0  ;;  %v1425_v15 = vmax.f32 %v3818_v38, 0.0  ;;  %v1427_v38 = vmax.f32 %v3825_v20, 0.0 }
 0x268   : > { %v3865_v25 = vadd.f32 %v1175_v6, %v1004_v32  ;;  %v1429_v20 = vmax.f32 %v3836_v53, 0.0  ;;  %v1431_v53 = vmax.f32 %v3852_v21, 0.0 }
 0x269   : > { %v3868_v16 = vadd.f32 %v1383_v61, %v3863_v34 }
 0x26a   : > { %v3871_v28 = vadd.f32 %v1378_v40, %v3865_v25  ;;  %v1422_v40 = vmax.f32 %v3810_v0, 0.0  ;;  %v1424_v0 = vmax.f32 %v3791_v24, 0.0  ;;  %v1426_v24 = vmax.f32 %v3804_v5, 0.0 }
 0x26b   : > { %v1428_v5 = vmax.f32 %v3839_v2, 0.0  ;;  %v1430_v2 = vmax.f32 %v3855_v48, 0.0  ;;  %v1433_v21 = vmax.f32 %v3868_v16, 0.0 }
 0x26c   : > { %v1432_v48 = vmax.f32 %v3871_v28, 0.0 }
 0x272   : > { %v2672_v49 = vpop.f32.mrb[12].mxu0 }
 0x273   : > { %v3879_v35 = vadd.f32 %v2672_v49, %v1007_v17  ;;  %v1185_v39 = vpop.f32.mrb[13].mxu0 }
 0x274   : > { %v3881_v9 = vadd.f32 %v1185_v39, %v1006_v41 }
 0x275   : > { %v3884_v44 = vadd.f32 %v1393_v58, %v3879_v35 }
 0x276   : > { %v3887_v37 = vadd.f32 %v1388_v30, %v3881_v9 }
 0x277   : > { %v1435_v16 = vmax.f32 %v3884_v44, 0.0 }
 0x278   : > { %v1434_v28 = vmax.f32 %v3887_v37, 0.0 }
 0x280   : > { %v2675_v4 = vpop.f32.mrb[14].mxu0 }
 0x281   : > { %v3895_v47 = vadd.f32 %v2675_v4, %v1009_v62  ;;  %v1195_v50 = vpop.f32.mrb[15].mxu0 }
 0x282   : > { %v3897_v23 = vadd.f32 %v1195_v50, %v1008_v3 }
 0x283   : > { %v3900_v19 = vadd.f32 %v1403_v43, %v3895_v47 }
 0x284   : > { %v3903_v10 = vadd.f32 %v1398_v8, %v3897_v23  ;;  %v2710_v27 = vpop.f32.mrb[16].mxu0 }
 0x285   : > { %v1590_v63 = vadd.f32 %v2710_v27, %v3774_v14  ;;  %v1584_v11 = vpop.f32.mrb[17].mxu0 }
 0x286   : > { %v1585_v31 = vadd.f32 %v3774_v14, %v1584_v11 }
 0x287   : > { %v1664_v56 = vadd.f32 %v1590_v63, %v3780_v12 }
 0x288   : > { %v1663_v45 = vadd.f32 %v1585_v31, %v3801_v52  ;;  %v2713_v54 = vpop.f32.mrb[18].mxu0 }
 0x289   : > { %v1680_v32 = vmax.f32 %v1664_v56, 0.0  ;;  %v1600_v61 = vadd.f32 %v2713_v54, %v3774_v14  ;;  %v1594_v18 = vpop.f32.mrb[19].mxu0 }
 0x28a   : > { %v1679_v6 = vmax.f32 %v1663_v45, 0.0  ;;  %v1595_v26 = vadd.f32 %v3774_v14, %v1594_v18 }
 0x28b   : > { %v3913_v33 = vadd.f32 %v1680_v32, %v1423_v29  ;;  %v1666_v46 = vadd.f32 %v1600_v61, %v3812_v57 }
 0x28c   : > { %v3916_v17 = vadd.f32 %v1679_v6, %v1422_v40  ;;  %v1665_v41 = vadd.f32 %v1595_v26, %v3788_v22  ;;  %v2716_v58 = vpop.f32.mrb[20].mxu0 }
 0x28d   : > { %v1682_v49 = vmax.f32 %v1666_v46, 0.0  ;;  %v1610_v30 = vadd.f32 %v2716_v58, %v3774_v14  ;;  %v1604_v39 = vpop.f32.mrb[21].mxu0 }
 0x28e   : > { %v1681_v55 = vmax.f32 %v1665_v41, 0.0  ;;  %v1605_v60 = vadd.f32 %v3774_v14, %v1604_v39 }
 0x28f   : > { %v3923_v62 = vadd.f32 %v1682_v49, %v1425_v15  ;;  %v1668_v3 = vadd.f32 %v1610_v30, %v3820_v42 }
 0x290   : > { %v3926_v43 = vadd.f32 %v1681_v55, %v1424_v0  ;;  %v1667_v4 = vadd.f32 %v1605_v60, %v3799_v59  ;;  %v2719_v8 = vpop.f32.mrb[22].mxu0 }
 0x291   : > { %v1684_v50 = vmax.f32 %v1668_v3, 0.0  ;;  %v1620_v27 = vadd.f32 %v2719_v8, %v3774_v14  ;;  %v1614_v63 = vpop.f32.mrb[23].mxu0 }
 0x292   : > { %v1683_v11 = vmax.f32 %v1667_v4, 0.0  ;;  %v1615_v31 = vadd.f32 %v3774_v14, %v1614_v63 }
 0x293   : > { %v3933_v56 = vadd.f32 %v1684_v50, %v1427_v38  ;;  %v1670_v45 = vadd.f32 %v1620_v27, %v3831_v36 }
 0x294   : > { %v3936_v54 = vadd.f32 %v1683_v11, %v1426_v24  ;;  %v1669_v29 = vadd.f32 %v1615_v31, %v3833_v7  ;;  %v2722_v32 = vpop.f32.mrb[24].mxu0 }
 0x295   : > { %v1686_v61 = vmax.f32 %v1670_v45, 0.0  ;;  %v1630_v18 = vadd.f32 %v2722_v32, %v3774_v14  ;;  %v1624_v40 = vpop.f32.mrb[25].mxu0 }
 0x296   : > { %v1685_v6 = vmax.f32 %v1669_v29, 0.0  ;;  %v1625_v26 = vadd.f32 %v3774_v14, %v1624_v40 }
 0x297   : > { %v3943_v46 = vadd.f32 %v1686_v61, %v1429_v20  ;;  %v1672_v41 = vadd.f32 %v1630_v18, %v3847_v51 }
 0x298   : > { %v3946_v58 = vadd.f32 %v1685_v6, %v1428_v5  ;;  %v1671_v15 = vadd.f32 %v1625_v26, %v3849_v13  ;;  %v2725_v49 = vpop.f32.mrb[26].mxu0 }
 0x299   : > { %v1688_v30 = vmax.f32 %v1672_v41, 0.0  ;;  %v1640_v39 = vadd.f32 %v2725_v49, %v3774_v14  ;;  %v1634_v0 = vpop.f32.mrb[27].mxu0 }
 0x29a   : > { %v1687_v55 = vmax.f32 %v1671_v15, 0.0  ;;  %v1635_v60 = vadd.f32 %v3774_v14, %v1634_v0 }
 0x29b   : > { %v3953_v3 = vadd.f32 %v1688_v30, %v1431_v53  ;;  %v1674_v4 = vadd.f32 %v1640_v39, %v3863_v34 }
 0x29c   : > { %v3956_v8 = vadd.f32 %v1687_v55, %v1430_v2  ;;  %v1673_v38 = vadd.f32 %v1635_v60, %v3865_v25  ;;  %v2728_v50 = vpop.f32.mrb[28].mxu0  ;;  %v1437_v2 = vmax.f32 %v3900_v19, 0.0  ;;  %v1436_v60 = vmax.f32 %v3903_v10, 0.0 }
 0x29d   : > { %v1690_v27 = vmax.f32 %v1674_v4, 0.0  ;;  %v1650_v63 = vadd.f32 %v2728_v50, %v3774_v14  ;;  %v1644_v24 = vpop.f32.mrb[29].mxu0 }
 0x29e   : > { %v1689_v11 = vmax.f32 %v1673_v38, 0.0  ;;  %v1645_v31 = vadd.f32 %v3774_v14, %v1644_v24 }
 0x29f   : > { %v3963_v45 = vadd.f32 %v1690_v27, %v1433_v21  ;;  %v1676_v29 = vadd.f32 %v1650_v63, %v3879_v35 }
 0x2a0   : > { %v3966_v32 = vadd.f32 %v1689_v11, %v1432_v48  ;;  %v1675_v20 = vadd.f32 %v1645_v31, %v3881_v9  ;;  %v2731_v61 = vpop.f32.mrb[30].mxu0 }
 0x2a1   : > { %v1692_v18 = vmax.f32 %v1676_v29, 0.0  ;;  %v1660_v40 = vadd.f32 %v2731_v61, %v3774_v14  ;;  %v1654_v5 = vpop.f32.mrb[31].mxu0 }
 0x2a2   : > { %v1691_v6 = vmax.f32 %v1675_v20, 0.0  ;;  %v1655_v26 = vadd.f32 %v3774_v14, %v1654_v5  ;;  %v2738_v41 = vpop.f32.mrb[16].mxu1 }
 0x2a3   : > { %v3973_v15 = vadd.f32 %v1692_v18, %v1435_v16  ;;  %v1678_v49 = vadd.f32 %v1660_v40, %v3895_v47  ;;  %v1847_v53 = vadd.f32 %v2738_v41, %v3774_v14  ;;  %v1841_v30 = vpop.f32.mrb[17].mxu1 }
 0x2a4   : > { %v3977_v39 = vadd.f32 %v1691_v6, %v1434_v28  ;;  %v1677_v44 = vadd.f32 %v1655_v26, %v3897_v23  ;;  %v1842_v0 = vadd.f32 %v3774_v14, %v1841_v30 }
 0x2a5   : > { %v1694_v37 = vmax.f32 %v1678_v49, 0.0  ;;  %v1921_v55 = vadd.f32 %v1847_v53, %v3780_v12 }
 0x2a6   : > { %v1693_v4 = vmax.f32 %v1677_v44, 0.0  ;;  %v1920_v38 = vadd.f32 %v1842_v0, %v3801_v52  ;;  %v2766_v50 = vpop.f32.mrb[32].mxu0 }
 0x2a7   : > { %v3985_v21 = vadd.f32 %v1694_v37, %v1437_v2  ;;  %v1937_v27 = vmax.f32 %v1921_v55, 0.0  ;;  %v2104_v63 = vadd.f32 %v2766_v50, %v3774_v14  ;;  %v2098_v24 = vpop.f32.mrb[33].mxu0 }
 0x2a8   : > { %v3988_v48 = vadd.f32 %v1693_v4, %v1436_v60  ;;  %v1936_v11 = vmax.f32 %v1920_v38, 0.0  ;;  %v2099_v19 = vadd.f32 %v3774_v14, %v2098_v24 }
 0x2a9   : > { %v1953_v31 = vadd.f32 %v1937_v27, %v3913_v33  ;;  %v2178_v29 = vadd.f32 %v2104_v63, %v3780_v12 }
 0x2aa   : > { %v1952_v10 = vadd.f32 %v1936_v11, %v3916_v17  ;;  %v2177_v20 = vadd.f32 %v2099_v19, %v3801_v52  ;;  %v2741_v61 = vpop.f32.mrb[18].mxu1 }
 0x2ab   : > { %v2194_v16 = vmax.f32 %v2178_v29, 0.0  ;;  %v1857_v18 = vadd.f32 %v2741_v61, %v3774_v14  ;;  %v1851_v40 = vpop.f32.mrb[19].mxu1 }
 0x2ac   : > { %v2193_v5 = vmax.f32 %v2177_v20, 0.0  ;;  %v1852_v28 = vadd.f32 %v3774_v14, %v1851_v40 }
 0x2ad   : > { %v2210_v6 = vadd.f32 %v2194_v16, %v1953_v31  ;;  %v1923_v26 = vadd.f32 %v1857_v18, %v3812_v57 }
 0x2ae   : > { %v2209_v41 = vadd.f32 %v2193_v5, %v1952_v10  ;;  %v1922_v33 = vadd.f32 %v1852_v28, %v3788_v22  ;;  %v2769_v12 = vpop.f32.mrb[34].mxu0 }
 0x2af   : > { %v1939_v49 = vmax.f32 %v1923_v26, 0.0  ;;  %v2114_v17 = vadd.f32 %v2769_v12, %v3774_v14  ;;  %v2108_v52 = vpop.f32.mrb[35].mxu0 }
 0x2b0   : > { %v2844_v30 = vpack.c.bf16 %v2210_v6, %v2209_v41  ;;  %v1938_v44 = vmax.f32 %v1922_v33, 0.0  ;;  %v2109_v0 = vadd.f32 %v3774_v14, %v2108_v52 }
 0x2b1   : > { %v1955_v2 = vadd.f32 %v1939_v49, %v3923_v62  ;;  %v2180_v37 = vadd.f32 %v2114_v17, %v3812_v57 }
 0x2b2   : > { %v1954_v55 = vadd.f32 %v1938_v44, %v3926_v43  ;;  %v2179_v60 = vadd.f32 %v2109_v0, %v3788_v22  ;;  %v2744_v4 = vpop.f32.mrb[20].mxu1  ;;  %2846 = vmatpush3.bf16.xpose.msk.msra.mxu1 %vm4002_vm4, %v2844_v30 }
 0x2b3   : > { %v2196_v38 = vmax.f32 %v2180_v37, 0.0  ;;  %v1867_v50 = vadd.f32 %v2744_v4, %v3774_v14  ;;  %v1861_v27 = vpop.f32.mrb[21].mxu1  ;;  %2847 = vmatprep.subr.bf16.mxu1 %v3024_v1 }
 0x2b4   : > { %v2195_v63 = vmax.f32 %v2179_v60, 0.0  ;;  %v1862_v24 = vadd.f32 %v3774_v14, %v1861_v27 }
 0x2b5   : > { %v2212_v62 = vadd.f32 %v2196_v38, %v1955_v2  ;;  %v1925_v57 = vadd.f32 %v1867_v50, %v3820_v42 }
 0x2b6   : > { %v2211_v11 = vadd.f32 %v2195_v63, %v1954_v55  ;;  %v1924_v43 = vadd.f32 %v1862_v24, %v3799_v59  ;;  %v2772_v22 = vpop.f32.mrb[36].mxu0 }
 0x2b7   : > { %v1941_v19 = vmax.f32 %v1925_v57, 0.0  ;;  %v2124_v31 = vadd.f32 %v2772_v22, %v3774_v14  ;;  %v2118_v29 = vpop.f32.mrb[37].mxu0 }
 0x2b8   : > { %v2848_v10 = vpack.c.bf16 %v2212_v62, %v2211_v11  ;;  %v1940_v20 = vmax.f32 %v1924_v43, 0.0  ;;  %v2119_v61 = vadd.f32 %v3774_v14, %v2118_v29 }
 0x2b9   : > { %v1957_v16 = vadd.f32 %v1941_v19, %v3933_v56  ;;  %v2182_v18 = vadd.f32 %v2124_v31, %v3820_v42 }
 0x2ba   : > { %v1956_v40 = vadd.f32 %v1940_v20, %v3936_v54  ;;  %v2181_v5 = vadd.f32 %v2119_v61, %v3799_v59  ;;  %v2747_v28 = vpop.f32.mrb[22].mxu1  ;;  %2850 = vmatpush3.bf16.xpose.msk.msra.mxu1 %vm4002_vm4, %v2848_v10 }
 0x2bb   : > { %v2198_v6 = vmax.f32 %v2182_v18, 0.0  ;;  %v1877_v26 = vadd.f32 %v2747_v28, %v3774_v14  ;;  %v1871_v41 = vpop.f32.mrb[23].mxu1  ;;  %2851 = vmatprep.subr.bf16.mxu1 %v3024_v1 }
 0x2bc   : > { %v2197_v33 = vmax.f32 %v2181_v5, 0.0  ;;  %v1872_v12 = vadd.f32 %v3774_v14, %v1871_v41 }
 0x2bd   : > { %v2214_v56 = vadd.f32 %v2198_v6, %v1957_v16  ;;  %v1927_v42 = vadd.f32 %v1877_v26, %v3831_v36 }
 0x2be   : > { %v2213_v49 = vadd.f32 %v2197_v33, %v1956_v40  ;;  %v1926_v54 = vadd.f32 %v1872_v12, %v3833_v7  ;;  %v2775_v59 = vpop.f32.mrb[38].mxu0 }
 0x2bf   : > { %v1943_v17 = vmax.f32 %v1927_v42, 0.0  ;;  %v2134_v52 = vadd.f32 %v2775_v59, %v3774_v14  ;;  %v2128_v30 = vpop.f32.mrb[39].mxu0 }
 0x2c0   : > { %v2852_v44 = vpack.c.bf16 %v2214_v56, %v2213_v49  ;;  %v1942_v0 = vmax.f32 %v1926_v54, 0.0  ;;  %v2129_v2 = vadd.f32 %v3774_v14, %v2128_v30 }
 0x2c1   : > { %v1959_v37 = vadd.f32 %v1943_v17, %v3943_v46  ;;  %v2184_v55 = vadd.f32 %v2134_v52, %v3831_v36 }
 0x2c2   : > { %v1958_v60 = vadd.f32 %v1942_v0, %v3946_v58  ;;  %v2183_v4 = vadd.f32 %v2129_v2, %v3833_v7  ;;  %v2750_v38 = vpop.f32.mrb[24].mxu1  ;;  %2854 = vmatpush3.bf16.xpose.msk.msra.mxu1 %vm4002_vm4, %v2852_v44 }
 0x2c3   : > { %v2200_v50 = vmax.f32 %v2184_v55, 0.0  ;;  %v1887_v27 = vadd.f32 %v2750_v38, %v3774_v14  ;;  %v1881_v63 = vpop.f32.mrb[25].mxu1  ;;  %2855 = vmatprep.subr.bf16.mxu1 %v3024_v1 }
 0x2c4   : > { %v2199_v24 = vmax.f32 %v2183_v4, 0.0  ;;  %v1882_v62 = vadd.f32 %v3774_v14, %v1881_v63 }
 0x2c5   : > { %v2216_v46 = vadd.f32 %v2200_v50, %v1959_v37  ;;  %v1929_v36 = vadd.f32 %v1887_v27, %v3847_v51 }
 0x2c6   : > { %v2215_v57 = vadd.f32 %v2199_v24, %v1958_v60  ;;  %v1928_v58 = vadd.f32 %v1882_v62, %v3849_v13  ;;  %v2778_v7 = vpop.f32.mrb[40].mxu0 }
 0x2c7   : > { %v1945_v11 = vmax.f32 %v1929_v36, 0.0  ;;  %v2144_v43 = vadd.f32 %v2778_v7, %v3774_v14  ;;  %v2138_v22 = vpop.f32.mrb[41].mxu0 }
 0x2c8   : > { %v2856_v19 = vpack.c.bf16 %v2216_v46, %v2215_v57  ;;  %v1944_v31 = vmax.f32 %v1928_v58, 0.0  ;;  %v2139_v29 = vadd.f32 %v3774_v14, %v2138_v22 }
 0x2c9   : > { %v1961_v10 = vadd.f32 %v1945_v11, %v3953_v3  ;;  %v2186_v20 = vadd.f32 %v2144_v43, %v3847_v51 }
 0x2ca   : > { %v1960_v61 = vadd.f32 %v1944_v31, %v3956_v8  ;;  %v2185_v16 = vadd.f32 %v2139_v29, %v3849_v13  ;;  %v2753_v18 = vpop.f32.mrb[26].mxu1  ;;  %2858 = vmatpush3.bf16.xpose.msk.msra.mxu1 %vm4002_vm4, %v2856_v19 }
 0x2cb   : > { %v2202_v40 = vmax.f32 %v2186_v20, 0.0  ;;  %v1897_v5 = vadd.f32 %v2753_v18, %v3774_v14  ;;  %v1891_v28 = vpop.f32.mrb[27].mxu1  ;;  %2859 = vmatprep.subr.bf16.mxu1 %v3024_v1 }
 0x2cc   : > { %v2201_v6 = vmax.f32 %v2185_v16, 0.0  ;;  %v1892_v26 = vadd.f32 %v3774_v14, %v1891_v28 }
 0x2cd   : > { %v2218_v3 = vadd.f32 %v2202_v40, %v1961_v10  ;;  %v1931_v51 = vadd.f32 %v1897_v5, %v3863_v34 }
 0x2ce   : > { %v2217_v41 = vadd.f32 %v2201_v6, %v1960_v61  ;;  %v1930_v8 = vadd.f32 %v1892_v26, %v3865_v25  ;;  %v2781_v13 = vpop.f32.mrb[42].mxu0 }
 0x2cf   : > { %v1947_v33 = vmax.f32 %v1931_v51, 0.0  ;;  %v2154_v12 = vadd.f32 %v2781_v13, %v3774_v14  ;;  %v2148_v56 = vpop.f32.mrb[43].mxu0 }
 0x2d0   : > { %v2860_v42 = vpack.c.bf16 %v2218_v3, %v2217_v41  ;;  %v1946_v49 = vmax.f32 %v1930_v8, 0.0  ;;  %v2149_v54 = vadd.f32 %v3774_v14, %v2148_v56 }
 0x2d1   : > { %v1963_v59 = vadd.f32 %v1947_v33, %v3963_v45  ;;  %v2188_v17 = vadd.f32 %v2154_v12, %v3863_v34 }
 0x2d2   : > { %v1962_v52 = vadd.f32 %v1946_v49, %v3966_v32  ;;  %v2187_v30 = vadd.f32 %v2149_v54, %v3865_v25  ;;  %v2756_v44 = vpop.f32.mrb[28].mxu1  ;;  %2862 = vmatpush3.bf16.xpose.msk.msra.mxu1 %vm4002_vm4, %v2860_v42 }
 0x2d3   : > { %v2204_v0 = vmax.f32 %v2188_v17, 0.0  ;;  %v1907_v2 = vadd.f32 %v2756_v44, %v3774_v14  ;;  %v1901_v37 = vpop.f32.mrb[29].mxu1  ;;  %2863 = vmatprep.subr.bf16.mxu1 %v3024_v1 }
 0x2d4   : > { %v2203_v55 = vmax.f32 %v2187_v30, 0.0  ;;  %v1902_v60 = vadd.f32 %v3774_v14, %v1901_v37 }
 0x2d5   : > { %v2220_v45 = vadd.f32 %v2204_v0, %v1963_v59  ;;  %v1933_v34 = vadd.f32 %v1907_v2, %v3879_v35 }
 0x2d6   : > { %v2219_v4 = vadd.f32 %v2203_v55, %v1962_v52  ;;  %v1932_v32 = vadd.f32 %v1902_v60, %v3881_v9  ;;  %v2784_v25 = vpop.f32.mrb[44].mxu0 }
 0x2d7   : > { %v1949_v38 = vmax.f32 %v1933_v34, 0.0  ;;  %v2164_v50 = vadd.f32 %v2784_v25, %v3774_v14  ;;  %v2158_v27 = vpop.f32.mrb[45].mxu0 }
 0x2d8   : > { %v2864_v63 = vpack.c.bf16 %v2220_v45, %v2219_v4  ;;  %v1948_v24 = vmax.f32 %v1932_v32, 0.0  ;;  %v2159_v62 = vadd.f32 %v3774_v14, %v2158_v27 }
 0x2d9   : > { %v1965_v46 = vadd.f32 %v1949_v38, %v3973_v15  ;;  %v2190_v36 = vadd.f32 %v2164_v50, %v3879_v35 }
 0x2da   : > { %v1964_v57 = vadd.f32 %v1948_v24, %v3977_v39  ;;  %v2189_v58 = vadd.f32 %v2159_v62, %v3881_v9  ;;  %v2759_v7 = vpop.f32.mrb[30].mxu1  ;;  %2866 = vmatpush3.bf16.xpose.msk.msra.mxu1 %vm4002_vm4, %v2864_v63 }
 0x2db   : > { %v2206_v11 = vmax.f32 %v2190_v36, 0.0  ;;  %v1917_v43 = vadd.f32 %v2759_v7, %v3774_v14  ;;  %v1911_v22 = vpop.f32.mrb[31].mxu1  ;;  %2867 = vmatprep.subr.bf16.mxu1 %v3024_v1 }
 0x2dc   : > { %v2205_v19 = vmax.f32 %v2189_v58, 0.0  ;;  %v1912_v31 = vadd.f32 %v3774_v14, %v1911_v22 }
 0x2dd   : > { %v2222_v15 = vadd.f32 %v2206_v11, %v1965_v46  ;;  %v1935_v35 = vadd.f32 %v1917_v43, %v3895_v47 }
 0x2de   : > { %v2221_v29 = vadd.f32 %v2205_v19, %v1964_v57  ;;  %v1934_v39 = vadd.f32 %v1912_v31, %v3897_v23  ;;  %v2787_v9 = vpop.f32.mrb[46].mxu0 }
 0x2df   : > { %v1951_v10 = vmax.f32 %v1935_v35, 0.0  ;;  %v2174_v20 = vadd.f32 %v2787_v9, %v3774_v14  ;;  %v2168_v61 = vpop.f32.mrb[47].mxu0 }
 0x2e0   : > { %v2868_v16 = vpack.c.bf16 %v2222_v15, %v2221_v29  ;;  %v1950_v18 = vmax.f32 %v1934_v39, 0.0  ;;  %v2169_v40 = vadd.f32 %v3774_v14, %v2168_v61 }
 0x2e1   : > { %v1967_v5 = vadd.f32 %v1951_v10, %v3985_v21  ;;  %v2192_v28 = vadd.f32 %v2174_v20, %v3895_v47  ;;  %v2225_v47 = vld [vmem:[%s4151_s6] sm:$0x1] }
 0x2e2   : > { %v1966_v6 = vadd.f32 %v1950_v18, %v3988_v48  ;;  %v2191_v26 = vadd.f32 %v2169_v40, %v3897_v23  ;;  %2870 = vmatpush3.bf16.xpose.msk.msra.mxu1 %vm4002_vm4, %v2868_v16  ;;  %v2227_v23 = vstv %s2226_s11 }
 0x2e3   : > { %v2208_v3 = vmax.f32 %v2192_v28, 0.0  ;;  %2871 = vmatprep.subr.bf16.mxu1 %v3024_v1 }
 0x2e4   : > { %v2207_v51 = vmax.f32 %v2191_v26, 0.0 }
 0x2e5   : > { %v2224_v41 = vadd.f32 %v2208_v3, %v1967_v5 }
 0x2e6   : > { %v2223_v8 = vadd.f32 %v2207_v51, %v1966_v6 }
 0x2e8   : > { %v2872_v14 = vpack.c.bf16 %v2224_v41, %v2223_v8 }
 0x2ea   : > { %2874 = vmatpush3.bf16.xpose.msk.msra.mxu1 %vm4002_vm4, %v2872_v14 }
 0x2f1   : > { %2821 = vmatmul.mubr.msk.f32.vlgmr.msra.gmra.mrb[32].mxu1 %vm2228_vm3, %v2225_v47 }
 0x3c4   : > { %v2346_v1 = vpop.f32.mrb[32].mxu1 }
 0x3c5   : > { %v2347_v21 = vadd.f32 %v2346_v1, %v2227_v23  ;;  %v2822_v48 = vpop.f32.mrb[33].mxu1 }
 0x3c7   : > { %2350 = vst [vmem:[%s315_s14] sm:$0x1] %v2347_v21 }
 0x3c8   : > { %2966 = shalt.err (!%p2963_p3)
}
 0x3c9   : > { %s2967_s18 = scalar_lea.hbm %s4103_s22, 16  ;;  %s2971_s11 = scalar_lea.hbm %s4153_s8, 32 }
 0x3ca   : > { %p2968_p4 = scmp.ne.s32.totalorder %s4103_s22, %s2967_s18  ;;  %p2972_p9 = scmp.lt.u32.totalorder %s4103_s22, %s4153_s8 }
 0x3cb   : > { %p2973_p10 = scmp.lt.u32.totalorder %s2971_s11, %s2967_s18  ;;  %p2975_p12 = scmp.lt.u32.totalorder %s2967_s18, %s4103_s22 }
 0x3cc   : > { %p2969_p7 = pnand %p2968_p4, %p3111_p5 }
 0x3cd   : > { %p2974_p11 = por %p2973_p10, %p2972_p9 }
 0x3ce   : > { %p2970_p8 = pneg %p2969_p7 }
 0x3cf   : > { %p2976_p13 = por %p2975_p12, %p2974_p11 }
 0x3d1   : > { %p2977_p0 = pnand %p2976_p13, %p2970_p8 }
 0x3d3   : > { %2980 = shalt.err (!%p2977_p0)
}
 0x3d4   : > { %2875 = dma.vmem_to_hbm [thread:$0]  (%p3111_p5), %s4105_s19, 16, %s4103_s22, %s2352_s24  }
 0x3d5 PF: > { %p2881_p1 = scmp.ge.s32.totalorder %s3015_s10, 2  ;;  %s2376_s20 = sand.u32 1, %s3003_s29  }
 0x3d6   : > { %s2377_s21 = scalar_lea.sflag [#allocation4], %s2376_s20 }
 0x3d7   : > { %p2878_p2 = pnand %p2881_p1, %p3115_p6 }
 0x3d9   : > { %2998 = dma.done.wait (!%p2878_p2), %s2377_s21, 16  }
 0x3da   : > { %3000 = vsyncadd (!%p2878_p2), %s2377_s21, 4294967280  ;;  %p19_p3 = scmp.ge.s32.totalorder %s3099_s12, 4   ;;  %s4158_s29 = smov %s3007_s30 }
 0x3db   : > { %s4159_s30 = smov %s3011_s9  ;;  %s4160_s9 = smov %s3109_s15 }
 0x3dc   : > { %s4161_s10 = smov %s3099_s12  ;;  %21 = sbr.rel (!%p19_p3) target bundleno = 5 (0x5), region = 90 }
 0x3e3   :  { %2381 = vsyncpa [#allocation4], 1 }
 0x3e4   :  { %2383 = vsyncpa [#allocation4 + $0x1], 1 }

</bundles_post_ra>
